<compile_context>
chip_gen: v6e
topology: v6e:2x2x1
jax: 0.10.0
libtpu: 0.0.40
codegen_flags: <defaults>
</compile_context>

<pallas_src>
import jax
import jax.numpy as jnp
from jax.experimental import pallas as pl
from jax.experimental.pallas import tpu as pltpu


def char_rnn_kernel(tok_ref, wih0_ref, whh0_ref, wstk_ref, b_ref, wtail_ref,
                    out_ref, x0p_ref, htop_ref):
    """One batch-block of the full forward pass.

    tok_ref   : [T, Bb, 1]            int32  tokens, timestep-major (read once, up front)
    wih0_ref  : [V, H]                bf16   layer-0 W_ih^T
    whh0_ref  : [H, H]                bf16   layer-0 W_hh^T
    wstk_ref  : [max(L-1,1), 2H, H]   bf16   stacked [W_ih^T ; W_hh^T] for layers 1..L-1
    b_ref     : [L, 1, H]             f32    pre-summed bias (b_ih + b_hh)
    wtail_ref : [H, O]                bf16   tail W^T (bias=False)
    out_ref   : [T, Bb, O]            f32    logits
    x0p_ref   : [T, Bb, H] f32 scratch       precomputed layer-0 input proj (+ bias[0])
    htop_ref  : [T, Bb, H] f32 scratch       top-layer hidden states (tail deferred)
    """
    T, Bb, O = out_ref.shape
    V, H = wih0_ref.shape
    L = b_ref.shape[0]

    # ---- off the serial chain: OneHot head + layer-0 input projection, ALL timesteps ----
    lane_iota = jax.lax.broadcasted_iota(jnp.int32, (T, Bb, V), 2)
    onehot = (lane_iota == tok_ref[...]).astype(jnp.float32).reshape(T * Bb, V)
    x0p = jnp.dot(onehot.astype(jnp.bfloat16), wih0_ref[...],
                  preferred_element_type=jnp.float32)                     # [T*Bb, H]
    # layer-0 bias is added at every step anyway: fold it in once, off the chain.
    x0p_ref[...] = (x0p + b_ref[0]).reshape(T, Bb, H)

    # Hoist bias broadcasts for layers 1..L-1 out of the (unrolled) time loop
    # (JAX does not CSE broadcast_in_dim; unrolled loop would emit T*L of them).
    b_rest = [jnp.broadcast_to(b_ref[i], (Bb, H)) for i in range(1, L)]

    def step(t, hs):
        # layer 0: only the recurrent matmul remains on the chain (input term precomputed)
        pre0 = x0p_ref[t] + jnp.dot(hs[0].astype(jnp.bfloat16), whh0_ref[...],
                                    preferred_element_type=jnp.float32)
        h = jnp.tanh(pre0)            # elementwise math stays f32 (no bf16 VPU/EUP on v5e)
        new_hs = [h]
        for i in range(1, L):
            # fused input + recurrent matmul: concat([x, h_prev]) @ [[W_ih^T];[W_hh^T]]
            xi = jnp.concatenate([new_hs[-1], hs[i]], axis=-1).astype(jnp.bfloat16)
            pre = jnp.dot(xi, wstk_ref[i - 1],
                          preferred_element_type=jnp.float32) + b_rest[i - 1]
            new_hs.append(jnp.tanh(pre))
        htop_ref[t] = new_hs[-1]       # DSLinear tail deferred off the chain
        return tuple(new_hs)

    # zero_states(): all layers start from zeros; states live in vregs as loop carry.
    hs0 = tuple(jnp.zeros((Bb, H), jnp.float32) for _ in range(L))
    # bounded partial unroll: full unroll at small T, capped so long sequences don't blow
    # instruction memory / vreg live ranges.
    jax.lax.fori_loop(0, T, step, hs0, unroll=min(T, 8))

    # ---- off the serial chain: deferred tail, one [T*Bb, H] @ [H, O] matmul ----
    # (for very large T*Bb, tile this matmul in 128/256-row chunks; trivial at demo size)
    h_all = htop_ref[...].reshape(T * Bb, H).astype(jnp.bfloat16)
    logits = jnp.dot(h_all, wtail_ref[...], preferred_element_type=jnp.float32)
    out_ref[...] = logits.reshape(T, Bb, O).astype(out_ref.dtype)


def char_rnn_forward(tokens, w_ih0_t, w_ih_rest_t, w_hh_t, b_ih, b_hh, w_tail_t,
                     batch_block=None):
    """tokens: [B, T] int32. Returns logits [T, B, O] (the module's per-step yields, stacked).

    batch_block: optional batch tile size (multiple of 8, divides B). A >1 grid over batch
    blocks is marked "parallel" so v7x can shard it across its two TensorCores.
    """
    B, T = tokens.shape
    L, _, H = w_hh_t.shape
    O = w_tail_t.shape[1]

    bb = B if batch_block is None else batch_block
    assert B % bb == 0 and bb % 8 == 0, "batch block must be a sublane-aligned divisor of B"

    # Timestep-major tokens with a trailing singleton; consumed once by the in-kernel
    # one-hot build (no per-step token loads).
    tok = jnp.transpose(tokens.astype(jnp.int32))[:, :, None]          # [T, B, 1]
    bias = (b_ih + b_hh).astype(jnp.float32)                           # [L, 1, H]

    # bf16 MXU operands, f32 accumulation via preferred_element_type in-kernel.
    wih0 = w_ih0_t.astype(jnp.bfloat16)                                # [V, H]
    whh0 = w_hh_t[0].astype(jnp.bfloat16)                              # [H, H]
    if L > 1:
        # stacked [[W_ih^T];[W_hh^T]] per layer 1..L-1 -> one fused K=2H matmul per step
        wstk = jnp.concatenate([w_ih_rest_t, w_hh_t[1:]], axis=1).astype(jnp.bfloat16)
    else:
        # tiny never-read placeholder (keeps the kernel signature fixed for depth-1)
        wstk = jnp.zeros((1, 8, 128), jnp.bfloat16)
    wtail = w_tail_t.astype(jnp.bfloat16)                              # [H, O]

    def full(arr):  # whole-array VMEM-resident operand (weights / bias)
        return pl.BlockSpec(arr.shape, lambda g, _nd=arr.ndim: (0,) * _nd)

    return pl.pallas_call(
        char_rnn_kernel,
        out_shape=jax.ShapeDtypeStruct((T, B, O), jnp.float32),
        grid_spec=pltpu.PrefetchScalarGridSpec(
            num_scalar_prefetch=0,
            grid=(B // bb,),
            in_specs=[
                pl.BlockSpec((T, bb, 1), lambda g: (0, g, 0)),   # tokens (batch-blocked)
                full(wih0), full(whh0), full(wstk), full(bias), full(wtail),
            ],
            out_specs=pl.BlockSpec((T, bb, O), lambda g: (0, g, 0)),
            scratch_shapes=[pltpu.VMEM((T, bb, H), jnp.float32),   # x0p (layer-0 input proj)
                            pltpu.VMEM((T, bb, H), jnp.float32)],  # top-layer hidden states
        ),
        compiler_params=pltpu.CompilerParams(
            dimension_semantics=("parallel",)),   # megacore sharding when B // bb > 1
    )(tok, wih0, whh0, wstk, bias, wtail)


def reference_forward(tokens, w_ih0_t, w_ih_rest_t, w_hh_t, b_ih, b_hh, w_tail_t):
    """Pure-JAX mirror of DSCharRNN.forward with cell_type='rnn' (tanh Elman cells), f32."""
    B, T = tokens.shape
    L, _, H = w_hh_t.shape
    V = w_ih0_t.shape[0]
    eye = jnp.eye(V, dtype=jnp.float32)
    states = [jnp.zeros((B, H), jnp.float32) for _ in range(L)]
    outs = []
    for t in range(T):
        out = eye[tokens[:, t]]                                   # OneHot head
        for i in range(L):
            w_in = w_ih0_t if i == 0 else w_ih_rest_t[i - 1]
            h = jnp.tanh(out @ w_in + b_ih[i] + states[i] @ w_hh_t[i] + b_hh[i])
            states[i] = h
            out = h
        outs.append(out @ w_tail_t)                               # DSLinear tail (no bias)
    return jnp.stack(outs, axis=0)                                # [T, B, O]


if __name__ == "__main__":
    # Small, module-consistent shapes (hidden_size=128 and depth=2 are the module defaults;
    # vocab/output of 128 keep the output lane-dense; batch=8 fills the sublane tile).
    batch = 8
    seq_len = 8
    vocab = 128        # input_size == one-hot width
    hidden = 128       # module default hidden_size
    depth = 2          # module default depth
    out_size = 128     # output_size (logits over the vocabulary)

    key = jax.random.PRNGKey(0)
    k_tok, k_wih0, k_wihr, k_whh, k_bih, k_bhh, k_tail = jax.random.split(key, 7)

    # PyTorch-style init U(-1/sqrt(hidden), 1/sqrt(hidden)); weights stored pre-transposed
    # ([in, hidden] / [hidden, out]) so the kernel does x @ W.
    bound = 1.0 / float(jnp.sqrt(jnp.float32(hidden)))
    tokens = jax.random.randint(k_tok, (batch, seq_len), 0, vocab, dtype=jnp.int32)
    w_ih0_t = jax.random.uniform(k_wih0, (vocab, hidden),
                                 minval=-bound, maxval=bound, dtype=jnp.float32)
    w_ih_rest_t = jax.random.uniform(k_wihr, (depth - 1, hidden, hidden),
                                     minval=-bound, maxval=bound, dtype=jnp.float32)
    w_hh_t = jax.random.uniform(k_whh, (depth, hidden, hidden),
                                minval=-bound, maxval=bound, dtype=jnp.float32)
    b_ih = jax.random.uniform(k_bih, (depth, 1, hidden),
                              minval=-bound, maxval=bound, dtype=jnp.float32)
    b_hh = jax.random.uniform(k_bhh, (depth, 1, hidden),
                              minval=-bound, maxval=bound, dtype=jnp.float32)
    w_tail_t = jax.random.uniform(k_tail, (hidden, out_size),
                                  minval=-bound, maxval=bound, dtype=jnp.float32)

    logits = char_rnn_forward(tokens, w_ih0_t, w_ih_rest_t, w_hh_t, b_ih, b_hh, w_tail_t)
    logits = jax.block_until_ready(logits)

    ref = reference_forward(tokens, w_ih0_t, w_ih_rest_t, w_hh_t, b_ih, b_hh, w_tail_t)
    ref = jax.block_until_ready(ref)

    assert logits.shape == (seq_len, batch, out_size)
    # Tolerance absorbs bf16 MXU operands (f32 accumulation) plus add-reordering from the
    # pre-summed bias / precomputed layer-0 projection across 8 recurrent steps; a semantic
    # bug would be off by O(1).
    assert jnp.allclose(logits, ref, atol=2e-2, rtol=2e-2), \
        float(jnp.max(jnp.abs(logits - ref)))

    print("KERNEL_OK")
</pallas_src>

<mosaic_0001>
module attributes {stable_mosaic.version = 11 : i64} {
  func.func @char_rnn_kernel(%arg0: i32, %arg1: memref<8x8x1xi32, #tpu.memory_space<vmem>>, %arg2: memref<128x128xbf16, #tpu.memory_space<vmem>>, %arg3: memref<128x128xbf16, #tpu.memory_space<vmem>>, %arg4: memref<1x256x128xbf16, #tpu.memory_space<vmem>>, %arg5: memref<2x1x128xf32, #tpu.memory_space<vmem>>, %arg6: memref<128x128xbf16, #tpu.memory_space<vmem>>, %arg7: memref<8x8x128xf32, #tpu.memory_space<vmem>>, %arg8: memref<8x8x128xf32, #tpu.memory_space<vmem>>, %arg9: memref<8x8x128xf32, #tpu.memory_space<vmem>>) attributes {dimension_semantics = [#tpu.dimension_semantics<parallel>], iteration_bounds = array<i64: 1>, scalar_prefetch = 0 : i64, scratch_operands = 2 : i64, tpu.core_type = #tpu.core_type<tc>, window_params = [{transform_indices = @transform_0, window_bounds = array<i64: 8, 8, 1>}, {pipeline_mode = #tpu.pipeline_mode<synchronous>, transform_indices = @transform_1, window_bounds = array<i64: 128, 128>}, {pipeline_mode = #tpu.pipeline_mode<synchronous>, transform_indices = @transform_2, window_bounds = array<i64: 128, 128>}, {pipeline_mode = #tpu.pipeline_mode<synchronous>, transform_indices = @transform_3, window_bounds = array<i64: 1, 256, 128>}, {pipeline_mode = #tpu.pipeline_mode<synchronous>, transform_indices = @transform_4, window_bounds = array<i64: 2, 1, 128>}, {pipeline_mode = #tpu.pipeline_mode<synchronous>, transform_indices = @transform_5, window_bounds = array<i64: 128, 128>}, {transform_indices = @transform_6, window_bounds = array<i64: 8, 8, 128>}]} {
    %0 = tpu.iota {dimensions = array<i32: 2>} : vector<8x8x128xi32>
    %c0 = arith.constant 0 : index
    %c0_0 = arith.constant 0 : index
    %c0_1 = arith.constant 0 : index
    %1 = vector.load %arg1[%c0, %c0_0, %c0_1] : memref<8x8x1xi32, #tpu.memory_space<vmem>>, vector<8x8x1xi32>
    %2 = vector.broadcast %1 : vector<8x8x1xi32> to vector<8x8x128xi32>
    %3 = arith.cmpi eq, %0, %2 : vector<8x8x128xi32>
    %4 = arith.extui %3 : vector<8x8x128xi1> to vector<8x8x128xi32>
    %5 = arith.sitofp %4 : vector<8x8x128xi32> to vector<8x8x128xf32>
    %6 = vector.shape_cast %5 : vector<8x8x128xf32> to vector<64x128xf32>
    %7 = arith.truncf %6 : vector<64x128xf32> to vector<64x128xbf16>
    %c0_2 = arith.constant 0 : index
    %c0_3 = arith.constant 0 : index
    %8 = vector.load %arg2[%c0_2, %c0_3] : memref<128x128xbf16, #tpu.memory_space<vmem>>, vector<128x128xbf16>
    %cst = arith.constant dense<0.000000e+00> : vector<64x128xf32>
    %9 = tpu.matmul %7, %8, %cst {dimension_numbers = #tpu.dot_dimension_numbers<[1], [0], [0], [1], [0, 0, 1, 1], [], []>} : vector<64x128xbf16>, vector<128x128xbf16>, vector<64x128xf32> -> vector<64x128xf32>
    %c0_4 = arith.constant 0 : index
    %c0_5 = arith.constant 0 : index
    %c0_6 = arith.constant 0 : index
    %10 = vector.load %arg5[%c0_4, %c0_5, %c0_6] : memref<2x1x128xf32, #tpu.memory_space<vmem>>, vector<1x1x128xf32>
    %11 = vector.shape_cast %10 : vector<1x1x128xf32> to vector<1x128xf32>
    %12 = vector.broadcast %11 : vector<1x128xf32> to vector<64x128xf32>
    %13 = arith.addf %9, %12 : vector<64x128xf32>
    %14 = vector.shape_cast %13 : vector<64x128xf32> to vector<8x8x128xf32>
    %c0_7 = arith.constant 0 : index
    %c0_8 = arith.constant 0 : index
    %c0_9 = arith.constant 0 : index
    %15 = vector.load %arg8[%c0_7, %c0_8, %c0_9] : memref<8x8x128xf32, #tpu.memory_space<vmem>>, vector<8x8x128xf32>
    tpu.vector_store %arg8[%c0_7, %c0_8, %c0_9], %14 {strides = array<i32>} : memref<8x8x128xf32, #tpu.memory_space<vmem>>, vector<8x8x128xf32>,
    %c1 = arith.constant 1 : index
    %c0_10 = arith.constant 0 : index
    %c0_11 = arith.constant 0 : index
    %16 = vector.load %arg5[%c1, %c0_10, %c0_11] : memref<2x1x128xf32, #tpu.memory_space<vmem>>, vector<1x1x128xf32>
    %17 = vector.shape_cast %16 : vector<1x1x128xf32> to vector<1x128xf32>
    %18 = vector.shape_cast %17 : vector<1x128xf32> to vector<1x128xf32>
    %19 = vector.broadcast %18 : vector<1x128xf32> to vector<8x128xf32>
    %cst_12 = arith.constant 0.000000e+00 : f32
    %20 = vector.broadcast %cst_12 : f32 to vector<8x128xf32>
    %cst_13 = arith.constant 0.000000e+00 : f32
    %21 = vector.broadcast %cst_13 : f32 to vector<8x128xf32>
    %c0_i32 = arith.constant 0 : i32
    %22 = arith.index_cast %c0_i32 : i32 to index
    %c0_14 = arith.constant 0 : index
    %c0_15 = arith.constant 0 : index
    %23 = vector.load %arg8[%22, %c0_14, %c0_15] : memref<8x8x128xf32, #tpu.memory_space<vmem>>, vector<1x8x128xf32>
    %24 = vector.shape_cast %23 : vector<1x8x128xf32> to vector<8x128xf32>
    %25 = arith.truncf %20 : vector<8x128xf32> to vector<8x128xbf16>
    %c0_16 = arith.constant 0 : index
    %c0_17 = arith.constant 0 : index
    %26 = vector.load %arg3[%c0_16, %c0_17] : memref<128x128xbf16, #tpu.memory_space<vmem>>, vector<128x128xbf16>
    %cst_18 = arith.constant dense<0.000000e+00> : vector<8x128xf32>
    %27 = tpu.matmul %25, %26, %cst_18 {dimension_numbers = #tpu.dot_dimension_numbers<[1], [0], [0], [1], [0, 0, 1, 1], [], []>} : vector<8x128xbf16>, vector<128x128xbf16>, vector<8x128xf32> -> vector<8x128xf32>
    %28 = arith.addf %24, %27 : vector<8x128xf32>
    %29 = math.tanh %28 : vector<8x128xf32>
    %30 = tpu.concatenate %29, %21 in 1 : vector<8x128xf32>, vector<8x128xf32> -> vector<8x256xf32>
    %31 = arith.truncf %30 : vector<8x256xf32> to vector<8x256xbf16>
    %c0_19 = arith.constant 0 : index
    %c0_20 = arith.constant 0 : index
    %c0_21 = arith.constant 0 : index
    %32 = vector.load %arg4[%c0_19, %c0_20, %c0_21] : memref<1x256x128xbf16, #tpu.memory_space<vmem>>, vector<1x256x128xbf16>
    %33 = vector.shape_cast %32 : vector<1x256x128xbf16> to vector<256x128xbf16>
    %cst_22 = arith.constant dense<0.000000e+00> : vector<8x128xf32>
    %34 = tpu.matmul %31, %33, %cst_22 {dimension_numbers = #tpu.dot_dimension_numbers<[1], [0], [0], [1], [0, 0, 1, 1], [], []>} : vector<8x256xbf16>, vector<256x128xbf16>, vector<8x128xf32> -> vector<8x128xf32>
    %35 = arith.addf %34, %19 : vector<8x128xf32>
    %36 = math.tanh %35 : vector<8x128xf32>
    %37 = arith.index_cast %c0_i32 : i32 to index
    %c0_23 = arith.constant 0 : index
    %c0_24 = arith.constant 0 : index
    %38 = vector.load %arg9[%37, %c0_23, %c0_24] : memref<8x8x128xf32, #tpu.memory_space<vmem>>, vector<1x8x128xf32>
    %39 = vector.shape_cast %38 : vector<1x8x128xf32> to vector<8x128xf32>
    %40 = vector.shape_cast %36 : vector<8x128xf32> to vector<1x8x128xf32>
    tpu.vector_store %arg9[%37, %c0_23, %c0_24], %40 {strides = array<i32>} : memref<8x8x128xf32, #tpu.memory_space<vmem>>, vector<1x8x128xf32>,
    %c1_i32 = arith.constant 1 : i32
    %41 = arith.index_cast %c1_i32 : i32 to index
    %c0_25 = arith.constant 0 : index
    %c0_26 = arith.constant 0 : index
    %42 = vector.load %arg8[%41, %c0_25, %c0_26] : memref<8x8x128xf32, #tpu.memory_space<vmem>>, vector<1x8x128xf32>
    %43 = vector.shape_cast %42 : vector<1x8x128xf32> to vector<8x128xf32>
    %44 = arith.truncf %29 : vector<8x128xf32> to vector<8x128xbf16>
    %c0_27 = arith.constant 0 : index
    %c0_28 = arith.constant 0 : index
    %45 = vector.load %arg3[%c0_27, %c0_28] : memref<128x128xbf16, #tpu.memory_space<vmem>>, vector<128x128xbf16>
    %cst_29 = arith.constant dense<0.000000e+00> : vector<8x128xf32>
    %46 = tpu.matmul %44, %45, %cst_29 {dimension_numbers = #tpu.dot_dimension_numbers<[1], [0], [0], [1], [0, 0, 1, 1], [], []>} : vector<8x128xbf16>, vector<128x128xbf16>, vector<8x128xf32> -> vector<8x128xf32>
    %47 = arith.addf %43, %46 : vector<8x128xf32>
    %48 = math.tanh %47 : vector<8x128xf32>
    %49 = tpu.concatenate %48, %36 in 1 : vector<8x128xf32>, vector<8x128xf32> -> vector<8x256xf32>
    %50 = arith.truncf %49 : vector<8x256xf32> to vector<8x256xbf16>
    %c0_30 = arith.constant 0 : index
    %c0_31 = arith.constant 0 : index
    %c0_32 = arith.constant 0 : index
    %51 = vector.load %arg4[%c0_30, %c0_31, %c0_32] : memref<1x256x128xbf16, #tpu.memory_space<vmem>>, vector<1x256x128xbf16>
    %52 = vector.shape_cast %51 : vector<1x256x128xbf16> to vector<256x128xbf16>
    %cst_33 = arith.constant dense<0.000000e+00> : vector<8x128xf32>
    %53 = tpu.matmul %50, %52, %cst_33 {dimension_numbers = #tpu.dot_dimension_numbers<[1], [0], [0], [1], [0, 0, 1, 1], [], []>} : vector<8x256xbf16>, vector<256x128xbf16>, vector<8x128xf32> -> vector<8x128xf32>
    %54 = arith.addf %53, %19 : vector<8x128xf32>
    %55 = math.tanh %54 : vector<8x128xf32>
    %56 = arith.index_cast %c1_i32 : i32 to index
    %c0_34 = arith.constant 0 : index
    %c0_35 = arith.constant 0 : index
    %57 = vector.load %arg9[%56, %c0_34, %c0_35] : memref<8x8x128xf32, #tpu.memory_space<vmem>>, vector<1x8x128xf32>
    %58 = vector.shape_cast %57 : vector<1x8x128xf32> to vector<8x128xf32>
    %59 = vector.shape_cast %55 : vector<8x128xf32> to vector<1x8x128xf32>
    tpu.vector_store %arg9[%56, %c0_34, %c0_35], %59 {strides = array<i32>} : memref<8x8x128xf32, #tpu.memory_space<vmem>>, vector<1x8x128xf32>,
    %c2_i32 = arith.constant 2 : i32
    %60 = arith.index_cast %c2_i32 : i32 to index
    %c0_36 = arith.constant 0 : index
    %c0_37 = arith.constant 0 : index
    %61 = vector.load %arg8[%60, %c0_36, %c0_37] : memref<8x8x128xf32, #tpu.memory_space<vmem>>, vector<1x8x128xf32>
    %62 = vector.shape_cast %61 : vector<1x8x128xf32> to vector<8x128xf32>
    %63 = arith.truncf %48 : vector<8x128xf32> to vector<8x128xbf16>
    %c0_38 = arith.constant 0 : index
    %c0_39 = arith.constant 0 : index
    %64 = vector.load %arg3[%c0_38, %c0_39] : memref<128x128xbf16, #tpu.memory_space<vmem>>, vector<128x128xbf16>
    %cst_40 = arith.constant dense<0.000000e+00> : vector<8x128xf32>
    %65 = tpu.matmul %63, %64, %cst_40 {dimension_numbers = #tpu.dot_dimension_numbers<[1], [0], [0], [1], [0, 0, 1, 1], [], []>} : vector<8x128xbf16>, vector<128x128xbf16>, vector<8x128xf32> -> vector<8x128xf32>
    %66 = arith.addf %62, %65 : vector<8x128xf32>
    %67 = math.tanh %66 : vector<8x128xf32>
    %68 = tpu.concatenate %67, %55 in 1 : vector<8x128xf32>, vector<8x128xf32> -> vector<8x256xf32>
    %69 = arith.truncf %68 : vector<8x256xf32> to vector<8x256xbf16>
    %c0_41 = arith.constant 0 : index
    %c0_42 = arith.constant 0 : index
    %c0_43 = arith.constant 0 : index
    %70 = vector.load %arg4[%c0_41, %c0_42, %c0_43] : memref<1x256x128xbf16, #tpu.memory_space<vmem>>, vector<1x256x128xbf16>
    %71 = vector.shape_cast %70 : vector<1x256x128xbf16> to vector<256x128xbf16>
    %cst_44 = arith.constant dense<0.000000e+00> : vector<8x128xf32>
    %72 = tpu.matmul %69, %71, %cst_44 {dimension_numbers = #tpu.dot_dimension_numbers<[1], [0], [0], [1], [0, 0, 1, 1], [], []>} : vector<8x256xbf16>, vector<256x128xbf16>, vector<8x128xf32> -> vector<8x128xf32>
    %73 = arith.addf %72, %19 : vector<8x128xf32>
    %74 = math.tanh %73 : vector<8x128xf32>
    %75 = arith.index_cast %c2_i32 : i32 to index
    %c0_45 = arith.constant 0 : index
    %c0_46 = arith.constant 0 : index
    %76 = vector.load %arg9[%75, %c0_45, %c0_46] : memref<8x8x128xf32, #tpu.memory_space<vmem>>, vector<1x8x128xf32>
    %77 = vector.shape_cast %76 : vector<1x8x128xf32> to vector<8x128xf32>
    %78 = vector.shape_cast %74 : vector<8x128xf32> to vector<1x8x128xf32>
    tpu.vector_store %arg9[%75, %c0_45, %c0_46], %78 {strides = array<i32>} : memref<8x8x128xf32, #tpu.memory_space<vmem>>, vector<1x8x128xf32>,
    %c3_i32 = arith.constant 3 : i32
    %79 = arith.index_cast %c3_i32 : i32 to index
    %c0_47 = arith.constant 0 : index
    %c0_48 = arith.constant 0 : index
    %80 = vector.load %arg8[%79, %c0_47, %c0_48] : memref<8x8x128xf32, #tpu.memory_space<vmem>>, vector<1x8x128xf32>
    %81 = vector.shape_cast %80 : vector<1x8x128xf32> to vector<8x128xf32>
    %82 = arith.truncf %67 : vector<8x128xf32> to vector<8x128xbf16>
    %c0_49 = arith.constant 0 : index
    %c0_50 = arith.constant 0 : index
    %83 = vector.load %arg3[%c0_49, %c0_50] : memref<128x128xbf16, #tpu.memory_space<vmem>>, vector<128x128xbf16>
    %cst_51 = arith.constant dense<0.000000e+00> : vector<8x128xf32>
    %84 = tpu.matmul %82, %83, %cst_51 {dimension_numbers = #tpu.dot_dimension_numbers<[1], [0], [0], [1], [0, 0, 1, 1], [], []>} : vector<8x128xbf16>, vector<128x128xbf16>, vector<8x128xf32> -> vector<8x128xf32>
    %85 = arith.addf %81, %84 : vector<8x128xf32>
    %86 = math.tanh %85 : vector<8x128xf32>
    %87 = tpu.concatenate %86, %74 in 1 : vector<8x128xf32>, vector<8x128xf32> -> vector<8x256xf32>
    %88 = arith.truncf %87 : vector<8x256xf32> to vector<8x256xbf16>
    %c0_52 = arith.constant 0 : index
    %c0_53 = arith.constant 0 : index
    %c0_54 = arith.constant 0 : index
    %89 = vector.load %arg4[%c0_52, %c0_53, %c0_54] : memref<1x256x128xbf16, #tpu.memory_space<vmem>>, vector<1x256x128xbf16>
    %90 = vector.shape_cast %89 : vector<1x256x128xbf16> to vector<256x128xbf16>
    %cst_55 = arith.constant dense<0.000000e+00> : vector<8x128xf32>
    %91 = tpu.matmul %88, %90, %cst_55 {dimension_numbers = #tpu.dot_dimension_numbers<[1], [0], [0], [1], [0, 0, 1, 1], [], []>} : vector<8x256xbf16>, vector<256x128xbf16>, vector<8x128xf32> -> vector<8x128xf32>
    %92 = arith.addf %91, %19 : vector<8x128xf32>
    %93 = math.tanh %92 : vector<8x128xf32>
    %94 = arith.index_cast %c3_i32 : i32 to index
    %c0_56 = arith.constant 0 : index
    %c0_57 = arith.constant 0 : index
    %95 = vector.load %arg9[%94, %c0_56, %c0_57] : memref<8x8x128xf32, #tpu.memory_space<vmem>>, vector<1x8x128xf32>
    %96 = vector.shape_cast %95 : vector<1x8x128xf32> to vector<8x128xf32>
    %97 = vector.shape_cast %93 : vector<8x128xf32> to vector<1x8x128xf32>
    tpu.vector_store %arg9[%94, %c0_56, %c0_57], %97 {strides = array<i32>} : memref<8x8x128xf32, #tpu.memory_space<vmem>>, vector<1x8x128xf32>,
    %c4_i32 = arith.constant 4 : i32
    %98 = arith.index_cast %c4_i32 : i32 to index
    %c0_58 = arith.constant 0 : index
    %c0_59 = arith.constant 0 : index
    %99 = vector.load %arg8[%98, %c0_58, %c0_59] : memref<8x8x128xf32, #tpu.memory_space<vmem>>, vector<1x8x128xf32>
    %100 = vector.shape_cast %99 : vector<1x8x128xf32> to vector<8x128xf32>
    %101 = arith.truncf %86 : vector<8x128xf32> to vector<8x128xbf16>
    %c0_60 = arith.constant 0 : index
    %c0_61 = arith.constant 0 : index
    %102 = vector.load %arg3[%c0_60, %c0_61] : memref<128x128xbf16, #tpu.memory_space<vmem>>, vector<128x128xbf16>
    %cst_62 = arith.constant dense<0.000000e+00> : vector<8x128xf32>
    %103 = tpu.matmul %101, %102, %cst_62 {dimension_numbers = #tpu.dot_dimension_numbers<[1], [0], [0], [1], [0, 0, 1, 1], [], []>} : vector<8x128xbf16>, vector<128x128xbf16>, vector<8x128xf32> -> vector<8x128xf32>
    %104 = arith.addf %100, %103 : vector<8x128xf32>
    %105 = math.tanh %104 : vector<8x128xf32>
    %106 = tpu.concatenate %105, %93 in 1 : vector<8x128xf32>, vector<8x128xf32> -> vector<8x256xf32>
    %107 = arith.truncf %106 : vector<8x256xf32> to vector<8x256xbf16>
    %c0_63 = arith.constant 0 : index
    %c0_64 = arith.constant 0 : index
    %c0_65 = arith.constant 0 : index
    %108 = vector.load %arg4[%c0_63, %c0_64, %c0_65] : memref<1x256x128xbf16, #tpu.memory_space<vmem>>, vector<1x256x128xbf16>
    %109 = vector.shape_cast %108 : vector<1x256x128xbf16> to vector<256x128xbf16>
    %cst_66 = arith.constant dense<0.000000e+00> : vector<8x128xf32>
    %110 = tpu.matmul %107, %109, %cst_66 {dimension_numbers = #tpu.dot_dimension_numbers<[1], [0], [0], [1], [0, 0, 1, 1], [], []>} : vector<8x256xbf16>, vector<256x128xbf16>, vector<8x128xf32> -> vector<8x128xf32>
    %111 = arith.addf %110, %19 : vector<8x128xf32>
    %112 = math.tanh %111 : vector<8x128xf32>
    %113 = arith.index_cast %c4_i32 : i32 to index
    %c0_67 = arith.constant 0 : index
    %c0_68 = arith.constant 0 : index
    %114 = vector.load %arg9[%113, %c0_67, %c0_68] : memref<8x8x128xf32, #tpu.memory_space<vmem>>, vector<1x8x128xf32>
    %115 = vector.shape_cast %114 : vector<1x8x128xf32> to vector<8x128xf32>
    %116 = vector.shape_cast %112 : vector<8x128xf32> to vector<1x8x128xf32>
    tpu.vector_store %arg9[%113, %c0_67, %c0_68], %116 {strides = array<i32>} : memref<8x8x128xf32, #tpu.memory_space<vmem>>, vector<1x8x128xf32>,
    %c5_i32 = arith.constant 5 : i32
    %117 = arith.index_cast %c5_i32 : i32 to index
    %c0_69 = arith.constant 0 : index
    %c0_70 = arith.constant 0 : index
    %118 = vector.load %arg8[%117, %c0_69, %c0_70] : memref<8x8x128xf32, #tpu.memory_space<vmem>>, vector<1x8x128xf32>
    %119 = vector.shape_cast %118 : vector<1x8x128xf32> to vector<8x128xf32>
    %120 = arith.truncf %105 : vector<8x128xf32> to vector<8x128xbf16>
    %c0_71 = arith.constant 0 : index
    %c0_72 = arith.constant 0 : index
    %121 = vector.load %arg3[%c0_71, %c0_72] : memref<128x128xbf16, #tpu.memory_space<vmem>>, vector<128x128xbf16>
    %cst_73 = arith.constant dense<0.000000e+00> : vector<8x128xf32>
    %122 = tpu.matmul %120, %121, %cst_73 {dimension_numbers = #tpu.dot_dimension_numbers<[1], [0], [0], [1], [0, 0, 1, 1], [], []>} : vector<8x128xbf16>, vector<128x128xbf16>, vector<8x128xf32> -> vector<8x128xf32>
    %123 = arith.addf %119, %122 : vector<8x128xf32>
    %124 = math.tanh %123 : vector<8x128xf32>
    %125 = tpu.concatenate %124, %112 in 1 : vector<8x128xf32>, vector<8x128xf32> -> vector<8x256xf32>
    %126 = arith.truncf %125 : vector<8x256xf32> to vector<8x256xbf16>
    %c0_74 = arith.constant 0 : index
    %c0_75 = arith.constant 0 : index
    %c0_76 = arith.constant 0 : index
    %127 = vector.load %arg4[%c0_74, %c0_75, %c0_76] : memref<1x256x128xbf16, #tpu.memory_space<vmem>>, vector<1x256x128xbf16>
    %128 = vector.shape_cast %127 : vector<1x256x128xbf16> to vector<256x128xbf16>
    %cst_77 = arith.constant dense<0.000000e+00> : vector<8x128xf32>
    %129 = tpu.matmul %126, %128, %cst_77 {dimension_numbers = #tpu.dot_dimension_numbers<[1], [0], [0], [1], [0, 0, 1, 1], [], []>} : vector<8x256xbf16>, vector<256x128xbf16>, vector<8x128xf32> -> vector<8x128xf32>
    %130 = arith.addf %129, %19 : vector<8x128xf32>
    %131 = math.tanh %130 : vector<8x128xf32>
    %132 = arith.index_cast %c5_i32 : i32 to index
    %c0_78 = arith.constant 0 : index
    %c0_79 = arith.constant 0 : index
    %133 = vector.load %arg9[%132, %c0_78, %c0_79] : memref<8x8x128xf32, #tpu.memory_space<vmem>>, vector<1x8x128xf32>
    %134 = vector.shape_cast %133 : vector<1x8x128xf32> to vector<8x128xf32>
    %135 = vector.shape_cast %131 : vector<8x128xf32> to vector<1x8x128xf32>
    tpu.vector_store %arg9[%132, %c0_78, %c0_79], %135 {strides = array<i32>} : memref<8x8x128xf32, #tpu.memory_space<vmem>>, vector<1x8x128xf32>,
    %c6_i32 = arith.constant 6 : i32
    %136 = arith.index_cast %c6_i32 : i32 to index
    %c0_80 = arith.constant 0 : index
    %c0_81 = arith.constant 0 : index
    %137 = vector.load %arg8[%136, %c0_80, %c0_81] : memref<8x8x128xf32, #tpu.memory_space<vmem>>, vector<1x8x128xf32>
    %138 = vector.shape_cast %137 : vector<1x8x128xf32> to vector<8x128xf32>
    %139 = arith.truncf %124 : vector<8x128xf32> to vector<8x128xbf16>
    %c0_82 = arith.constant 0 : index
    %c0_83 = arith.constant 0 : index
    %140 = vector.load %arg3[%c0_82, %c0_83] : memref<128x128xbf16, #tpu.memory_space<vmem>>, vector<128x128xbf16>
    %cst_84 = arith.constant dense<0.000000e+00> : vector<8x128xf32>
    %141 = tpu.matmul %139, %140, %cst_84 {dimension_numbers = #tpu.dot_dimension_numbers<[1], [0], [0], [1], [0, 0, 1, 1], [], []>} : vector<8x128xbf16>, vector<128x128xbf16>, vector<8x128xf32> -> vector<8x128xf32>
    %142 = arith.addf %138, %141 : vector<8x128xf32>
    %143 = math.tanh %142 : vector<8x128xf32>
    %144 = tpu.concatenate %143, %131 in 1 : vector<8x128xf32>, vector<8x128xf32> -> vector<8x256xf32>
    %145 = arith.truncf %144 : vector<8x256xf32> to vector<8x256xbf16>
    %c0_85 = arith.constant 0 : index
    %c0_86 = arith.constant 0 : index
    %c0_87 = arith.constant 0 : index
    %146 = vector.load %arg4[%c0_85, %c0_86, %c0_87] : memref<1x256x128xbf16, #tpu.memory_space<vmem>>, vector<1x256x128xbf16>
    %147 = vector.shape_cast %146 : vector<1x256x128xbf16> to vector<256x128xbf16>
    %cst_88 = arith.constant dense<0.000000e+00> : vector<8x128xf32>
    %148 = tpu.matmul %145, %147, %cst_88 {dimension_numbers = #tpu.dot_dimension_numbers<[1], [0], [0], [1], [0, 0, 1, 1], [], []>} : vector<8x256xbf16>, vector<256x128xbf16>, vector<8x128xf32> -> vector<8x128xf32>
    %149 = arith.addf %148, %19 : vector<8x128xf32>
    %150 = math.tanh %149 : vector<8x128xf32>
    %151 = arith.index_cast %c6_i32 : i32 to index
    %c0_89 = arith.constant 0 : index
    %c0_90 = arith.constant 0 : index
    %152 = vector.load %arg9[%151, %c0_89, %c0_90] : memref<8x8x128xf32, #tpu.memory_space<vmem>>, vector<1x8x128xf32>
    %153 = vector.shape_cast %152 : vector<1x8x128xf32> to vector<8x128xf32>
    %154 = vector.shape_cast %150 : vector<8x128xf32> to vector<1x8x128xf32>
    tpu.vector_store %arg9[%151, %c0_89, %c0_90], %154 {strides = array<i32>} : memref<8x8x128xf32, #tpu.memory_space<vmem>>, vector<1x8x128xf32>,
    %c7_i32 = arith.constant 7 : i32
    %155 = arith.index_cast %c7_i32 : i32 to index
    %c0_91 = arith.constant 0 : index
    %c0_92 = arith.constant 0 : index
    %156 = vector.load %arg8[%155, %c0_91, %c0_92] : memref<8x8x128xf32, #tpu.memory_space<vmem>>, vector<1x8x128xf32>
    %157 = vector.shape_cast %156 : vector<1x8x128xf32> to vector<8x128xf32>
    %158 = arith.truncf %143 : vector<8x128xf32> to vector<8x128xbf16>
    %c0_93 = arith.constant 0 : index
    %c0_94 = arith.constant 0 : index
    %159 = vector.load %arg3[%c0_93, %c0_94] : memref<128x128xbf16, #tpu.memory_space<vmem>>, vector<128x128xbf16>
    %cst_95 = arith.constant dense<0.000000e+00> : vector<8x128xf32>
    %160 = tpu.matmul %158, %159, %cst_95 {dimension_numbers = #tpu.dot_dimension_numbers<[1], [0], [0], [1], [0, 0, 1, 1], [], []>} : vector<8x128xbf16>, vector<128x128xbf16>, vector<8x128xf32> -> vector<8x128xf32>
    %161 = arith.addf %157, %160 : vector<8x128xf32>
    %162 = math.tanh %161 : vector<8x128xf32>
    %163 = tpu.concatenate %162, %150 in 1 : vector<8x128xf32>, vector<8x128xf32> -> vector<8x256xf32>
    %164 = arith.truncf %163 : vector<8x256xf32> to vector<8x256xbf16>
    %c0_96 = arith.constant 0 : index
    %c0_97 = arith.constant 0 : index
    %c0_98 = arith.constant 0 : index
    %165 = vector.load %arg4[%c0_96, %c0_97, %c0_98] : memref<1x256x128xbf16, #tpu.memory_space<vmem>>, vector<1x256x128xbf16>
    %166 = vector.shape_cast %165 : vector<1x256x128xbf16> to vector<256x128xbf16>
    %cst_99 = arith.constant dense<0.000000e+00> : vector<8x128xf32>
    %167 = tpu.matmul %164, %166, %cst_99 {dimension_numbers = #tpu.dot_dimension_numbers<[1], [0], [0], [1], [0, 0, 1, 1], [], []>} : vector<8x256xbf16>, vector<256x128xbf16>, vector<8x128xf32> -> vector<8x128xf32>
    %168 = arith.addf %167, %19 : vector<8x128xf32>
    %169 = math.tanh %168 : vector<8x128xf32>
    %170 = arith.index_cast %c7_i32 : i32 to index
    %c0_100 = arith.constant 0 : index
    %c0_101 = arith.constant 0 : index
    %171 = vector.load %arg9[%170, %c0_100, %c0_101] : memref<8x8x128xf32, #tpu.memory_space<vmem>>, vector<1x8x128xf32>
    %172 = vector.shape_cast %171 : vector<1x8x128xf32> to vector<8x128xf32>
    %173 = vector.shape_cast %169 : vector<8x128xf32> to vector<1x8x128xf32>
    tpu.vector_store %arg9[%170, %c0_100, %c0_101], %173 {strides = array<i32>} : memref<8x8x128xf32, #tpu.memory_space<vmem>>, vector<1x8x128xf32>,
    %c8_i32 = arith.constant 8 : i32
    %c0_102 = arith.constant 0 : index
    %c0_103 = arith.constant 0 : index
    %c0_104 = arith.constant 0 : index
    %174 = vector.load %arg9[%c0_102, %c0_103, %c0_104] : memref<8x8x128xf32, #tpu.memory_space<vmem>>, vector<8x8x128xf32>
    %175 = vector.shape_cast %174 : vector<8x8x128xf32> to vector<64x128xf32>
    %176 = arith.truncf %175 : vector<64x128xf32> to vector<64x128xbf16>
    %c0_105 = arith.constant 0 : index
    %c0_106 = arith.constant 0 : index
    %177 = vector.load %arg6[%c0_105, %c0_106] : memref<128x128xbf16, #tpu.memory_space<vmem>>, vector<128x128xbf16>
    %cst_107 = arith.constant dense<0.000000e+00> : vector<64x128xf32>
    %178 = tpu.matmul %176, %177, %cst_107 {dimension_numbers = #tpu.dot_dimension_numbers<[1], [0], [0], [1], [0, 0, 1, 1], [], []>} : vector<64x128xbf16>, vector<128x128xbf16>, vector<64x128xf32> -> vector<64x128xf32>
    %179 = vector.shape_cast %178 : vector<64x128xf32> to vector<8x8x128xf32>
    %c0_108 = arith.constant 0 : index
    %c0_109 = arith.constant 0 : index
    %c0_110 = arith.constant 0 : index
    %180 = vector.load %arg7[%c0_108, %c0_109, %c0_110] : memref<8x8x128xf32, #tpu.memory_space<vmem>>, vector<8x8x128xf32>
    tpu.vector_store %arg7[%c0_108, %c0_109, %c0_110], %179 {strides = array<i32>} : memref<8x8x128xf32, #tpu.memory_space<vmem>>, vector<8x8x128xf32>,
    return
  }
  func.func @transform_0(%arg0: i32) -> (i32, i32, i32) {
    %c0_i32 = arith.constant 0 : i32
    %c0_i32_0 = arith.constant 0 : i32
    %c0_i32_1 = arith.constant 0 : i32
    return %c0_i32, %arg0, %c0_i32_0 : i32, i32, i32
  }
  func.func @transform_1(%arg0: i32) -> (i32, i32) {
    %c0_i32 = arith.constant 0 : i32
    %c0_i32_0 = arith.constant 0 : i32
    %c0_i32_1 = arith.constant 0 : i32
    return %c0_i32, %c0_i32_0 : i32, i32
  }
  func.func @transform_2(%arg0: i32) -> (i32, i32) {
    %c0_i32 = arith.constant 0 : i32
    %c0_i32_0 = arith.constant 0 : i32
    %c0_i32_1 = arith.constant 0 : i32
    return %c0_i32, %c0_i32_0 : i32, i32
  }
  func.func @transform_3(%arg0: i32) -> (i32, i32, i32) {
    %c0_i32 = arith.constant 0 : i32
    %c0_i32_0 = arith.constant 0 : i32
    %c0_i32_1 = arith.constant 0 : i32
    %c0_i32_2 = arith.constant 0 : i32
    return %c0_i32, %c0_i32_0, %c0_i32_1 : i32, i32, i32
  }
  func.func @transform_4(%arg0: i32) -> (i32, i32, i32) {
    %c0_i32 = arith.constant 0 : i32
    %c0_i32_0 = arith.constant 0 : i32
    %c0_i32_1 = arith.constant 0 : i32
    %c0_i32_2 = arith.constant 0 : i32
    return %c0_i32, %c0_i32_0, %c0_i32_1 : i32, i32, i32
  }
  func.func @transform_5(%arg0: i32) -> (i32, i32) {
    %c0_i32 = arith.constant 0 : i32
    %c0_i32_0 = arith.constant 0 : i32
    %c0_i32_1 = arith.constant 0 : i32
    return %c0_i32, %c0_i32_0 : i32, i32
  }
  func.func @transform_6(%arg0: i32) -> (i32, i32, i32) {
    %c0_i32 = arith.constant 0 : i32
    %c0_i32_0 = arith.constant 0 : i32
    %c0_i32_1 = arith.constant 0 : i32
    return %c0_i32, %arg0, %c0_i32_0 : i32, i32, i32
  }
}

</mosaic_0001>

<bundles_post_ra>
// kernel: tpu_custom_call.1
= control target key start
LH: loop header
LB: loop body
LE: loop exit
PB: predicated region body
PF: predicated region fallthrough
CT: control target
= control target key end

     0   :  { %11 = vsyncpa [#allocation5], 0  ;;  %s4004_s0 = inlined_call_operand.vmem [shape: s32[8,8,1], index: 0, kind: input, shape index: {}]   ;;  %s4005_s1 = inlined_call_operand.vmem [shape: bf16[128,128], index: 1, kind: input, shape index: {}]   ;;  %s4006_s2 = inlined_call_operand.hbm [shape: bf16[128,128], index: 2, kind: input, shape index: {}]   ;;  %s4007_s3 = inlined_call_operand.hbm [shape: bf16[1,256,128], index: 3, kind: input, shape index: {}]   ;;  %s4008_s4 = inlined_call_operand.vmem [shape: f32[2,1,128], index: 4, kind: input, shape index: {}]   ;;  %s4009_s5 = inlined_call_operand.hbm [shape: bf16[128,128], index: 5, kind: input, shape index: {}]   ;;  %s4010_s6 = inlined_call_operand.hbm [shape: f32[8,8,128], index: 6, kind: output, shape index: {}]  }
   0x1   :  { %12 = vsyncpa [#allocation8], 0 }
   0x2   :  { %13 = vsyncpa [#allocation6], 0  ;;  %s3741_s21 = smov [#allocation7]   ;;  %s3742_s23 = smov [#allocation4]  }
   0x3   :  { %s35_s22 = sshll.u32 %s3741_s21, 4  ;;  %s23_s24 = sshll.u32 %s3742_s23, 4  ;;  %s36_s22 = int_to_ptr.vmem [resolvable:$true] %s35_s22  ;;  %s24_s24 = int_to_ptr.vmem [resolvable:$true] %s23_s24 }
   0x4   :  { %s3663_s25 = scalar_lea.vmem %s36_s22, 2048  ;;  %p3668_p1 = scmp.lt.s32.totalorder %s36_s22, %s36_s22 }
   0x5   :  { %p3664_p0 = scmp.ne.s32.totalorder %s36_s22, %s3663_s25  ;;  %p3669_p2 = scmp.lt.s32.totalorder %s3663_s25, %s3663_s25 }
   0x7   :  { %p3670_p3 = por %p3669_p2, %p3668_p1 }
   0x9   :  { %p3671_p4 = pnand %p3670_p3, %p3664_p0 }
   0xb   :  { %3674 = shalt.err (!%p3671_p4)
}
   0xc   :  { %s3743_s26 = smov 64   ;;  %s3744_s27 = smov 4  }
   0xd   :  { %41 = dma.hbm_to_vmem [thread:$0]  %s4007_s3, 2048, %s36_s22, [#allocation8], %s3743_s26, %s3743_s26, %s3744_s27  }
   0xe   :  { %s3683_s30 = scalar_lea.vmem %s24_s24, 1024  ;;  %p3688_p6 = scmp.lt.s32.totalorder %s24_s24, %s24_s24 }
   0xf   :  { %p3684_p5 = scmp.ne.s32.totalorder %s24_s24, %s3683_s30  ;;  %p3689_p7 = scmp.lt.s32.totalorder %s3683_s30, %s3683_s30 }
  0x11   :  { %p3690_p8 = por %p3689_p7, %p3688_p6 }
  0x13   :  { %p3691_p9 = pnand %p3690_p8, %p3684_p5 }
  0x15   :  { %3694 = shalt.err (!%p3691_p9)
}
  0x16   :  { %29 = dma.hbm_to_vmem [thread:$0]  %s4006_s2, 1024, %s24_s24, [#allocation5], %s3743_s26, %s3743_s26, %s3744_s27  }
  0x17   :  { %s3745_s9 = smov [#allocation9]  }
  0x18   :  { %s49_s10 = sshll.u32 %s3745_s9, 4  ;;  %s50_s10 = int_to_ptr.vmem [resolvable:$true] %s49_s10 }
  0x19   :  { %s3703_s11 = scalar_lea.vmem %s50_s10, 1024  ;;  %p3708_p11 = scmp.lt.s32.totalorder %s50_s10, %s50_s10 }
  0x1a   :  { %p3704_p10 = scmp.ne.s32.totalorder %s50_s10, %s3703_s11  ;;  %p3709_p12 = scmp.lt.s32.totalorder %s3703_s11, %s3703_s11 }
  0x1c   :  { %p3710_p13 = por %p3709_p12, %p3708_p11 }
  0x1e   :  { %p3711_p0 = pnand %p3710_p13, %p3704_p10 }
  0x20   :  { %3714 = shalt.err (!%p3711_p0)
}
  0x21   :  { %55 = dma.hbm_to_vmem [thread:$0]  %s4009_s5, 1024, %s50_s10, [#allocation8], %s3743_s26, %s3743_s26, %s3744_s27  }
  0x22   :  { %3735 = dma.done.wait [#allocation5], 1024  }
  0x23   :  { %3736 = vsyncadd [#allocation5], 4294966272 }
  0x24   :  { %3737 = dma.done.wait [#allocation8], 3072  }
  0x25   :  { %3738 = vsyncadd [#allocation8], 4294964224  ;;  %v3746_v0 = vmov 0   ;;  %v3747_v1 = vmov 0.0   ;;  %v70_v2 = vld [vmem:[%s4004_s0 + $0x10] sm:$0xff]  ;;  %v68_v3 = vld [vmem:[%s4004_s0] sm:$0xff]  ;;  %v66_v21 = vlaneseq }
  0x26   :  { %3414 = vset.pattern.permute.xlu1 %v3746_v0  ;;  %3413 = vset.pattern.permute.xlu0 %v3746_v0  ;;  %v71_v4 = vld [vmem:[%s4004_s0 + $0x18] sm:$0xff]  ;;  %v69_v5 = vld [vmem:[%s4004_s0 + $0x8] sm:$0xff]  ;;  %vm3748_vm0 = vmmov 0   ;;  %v72_v8 = vld [vmem:[%s4004_s0 + $0x20] sm:$0xff]  ;;  %v3749_v37 = vmov 1.0|1.0  }
  0x27   :  { %3216 = vmatprep.subr.bf16.mxu1 %v3747_v1  ;;  %83 = vperm.xlu1 %3414, %v70_v2   ;;  %v3415_v6 = vld [vmem:[#allocation4 + $0x38] sm:$0xff]   ;;  %v73_v7 = vld [vmem:[%s4004_s0 + $0x28] sm:$0xff]  ;;  %v3417_v10 = vld [vmem:[#allocation4 + $0x30] sm:$0xff]   ;;  %v67_v25 = vand.u32 127, %v66_v21  ;;  %v3750_v61 = vmov 0.0|0.0  }
  0x28   :  { %77 = vperm.xlu0 %3413, %v68_v3   ;;  %3232 = vmatprep.mubr.msk.bf16.mxu1 %vm3748_vm0, %v3747_v1  ;;  %v3416_v9 = vld [vmem:[%s4005_s1 + $0x38] sm:$0xff]   ;;  %v3418_v11 = vld [vmem:[%s4005_s1 + $0x30] sm:$0xff]   ;;  %v3420_v13 = vld [vmem:[%s4005_s1 + $0x28] sm:$0xff]  }
  0x29   :  { %3217 = vmatpush3.bf16.msra.mxu1 %v3415_v6  ;;  %3192 = vmatprep.subr.bf16.mxu0 %v3416_v9  ;;  %v75_v12 = vld [vmem:[%s4004_s0 + $0x38] sm:$0xff]  ;;  %v74_v14 = vld [vmem:[%s4004_s0 + $0x30] sm:$0xff]  ;;  %v3419_v15 = vld [vmem:[#allocation4 + $0x28] sm:$0xff]  }
  0x2a   :  { %3193 = vmatpush3.bf16.msra.mxu0 %v3416_v9  ;;  %3218 = vmatprep.subr.bf16.mxu1 %v3747_v1  ;;  %v3422_v16 = vld [vmem:[%s4005_s1 + $0x20] sm:$0xff]   ;;  %v3424_v18 = vld [vmem:[%s4005_s1 + $0x18] sm:$0xff]   ;;  %v3426_v20 = vld [vmem:[%s4005_s1 + $0x10] sm:$0xff]  }
  0x2b   :  { %86 = vperm.xlu1 %3414, %v71_v4   ;;  %3194 = vmatprep.subr.bf16.mxu0 %v3418_v11  ;;  %v3421_v17 = vld [vmem:[#allocation4 + $0x20] sm:$0xff]   ;;  %v3423_v19 = vld [vmem:[#allocation4 + $0x18] sm:$0xff]   ;;  %v3425_v22 = vld [vmem:[#allocation4 + $0x10] sm:$0xff]  }
  0x2c   :  { %80 = vperm.xlu0 %3413, %v69_v5   ;;  %v3427_v23 = vld [vmem:[#allocation4 + $0x8] sm:$0xff]   ;;  %v3430_v26 = vld [vmem:[%s4005_s1] sm:$0xff]   ;;  %v3431_v28 = vld [vmem:[#allocation7 + $0x78] sm:$0xff]  }
  0x2d   :  { %3219 = vmatpush3.bf16.msra.mxu1 %v3417_v10  ;;  %v3428_v24 = vld [vmem:[%s4005_s1 + $0x8] sm:$0xff]   ;;  %v3429_v27 = vld [vmem:[#allocation4] sm:$0xff]   ;;  %v3433_v29 = vld [vmem:[#allocation4 + $0x38] sm:$0xff]  }
  0x2e   :  { %3195 = vmatpush3.bf16.msra.mxu0 %v3418_v11  ;;  %3220 = vmatprep.subr.bf16.mxu1 %v3747_v1  ;;  %v3436_v30 = vld [vmem:[#allocation4 + $0x30] sm:$0xff]   ;;  %v3432_v35 = vld [vmem:[#allocation7 + $0x38] sm:$0xff]   ;;  %v3437_v41 = vld [vmem:[#allocation7 + $0x68] sm:$0xff]  }
  0x2f   :  { %92 = vperm.xlu1 %3414, %v73_v7   ;;  %3196 = vmatprep.subr.bf16.mxu0 %v3420_v13  ;;  %v3434_v36 = vld [vmem:[#allocation7 + $0x70] sm:$0xff]   ;;  %v3438_v44 = vld [vmem:[#allocation7 + $0x28] sm:$0xff]   ;;  %v3440_v46 = vld [vmem:[#allocation7 + $0x60] sm:$0xff]  }
  0x30   :  { %89 = vperm.xlu0 %3413, %v72_v8   ;;  %v3435_v40 = vld [vmem:[#allocation7 + $0x30] sm:$0xff]   ;;  %v3439_v45 = vld [vmem:[#allocation4 + $0x28] sm:$0xff]   ;;  %v3441_v47 = vld [vmem:[#allocation7 + $0x20] sm:$0xff]  }
  0x31   :  { %3221 = vmatpush3.bf16.msra.mxu1 %v3419_v15  ;;  %v3442_v48 = vld [vmem:[#allocation4 + $0x20] sm:$0xff]   ;;  %v3443_v49 = vld [vmem:[#allocation7 + $0x58] sm:$0xff]   ;;  %v3446_v52 = vld [vmem:[#allocation7 + $0x50] sm:$0xff]  }
  0x32   :  { %3197 = vmatpush3.bf16.msra.mxu0 %v3420_v13  ;;  %3222 = vmatprep.subr.bf16.mxu1 %v3747_v1  ;;  %v3444_v50 = vld [vmem:[#allocation7 + $0x18] sm:$0xff]   ;;  %v3447_v53 = vld [vmem:[#allocation7 + $0x10] sm:$0xff]   ;;  %v3449_v55 = vld [vmem:[#allocation7 + $0x48] sm:$0xff]  }
  0x33   :  { %98 = vperm.xlu1 %3414, %v75_v12   ;;  %3198 = vmatprep.subr.bf16.mxu0 %v3422_v16  ;;  %v3445_v51 = vld [vmem:[#allocation4 + $0x18] sm:$0xff]   ;;  %v3448_v54 = vld [vmem:[#allocation4 + $0x10] sm:$0xff]   ;;  %v3450_v56 = vld [vmem:[#allocation7 + $0x8] sm:$0xff]  }
  0x34   :  { %95 = vperm.xlu0 %3413, %v74_v14   ;;  %v3451_v57 = vld [vmem:[#allocation4 + $0x8] sm:$0xff]   ;;  %v3452_v58 = vld [vmem:[#allocation7 + $0x40] sm:$0xff]   ;;  %v3456_v62 = vld [vmem:[#allocation7 + $0x78] sm:$0xff]  }
  0x35   :  { %3223 = vmatpush3.bf16.msra.mxu1 %v3421_v17  ;;  %v3453_v59 = vld [vmem:[#allocation7] sm:$0xff]   ;;  %v3458_v21 = vld [vmem:[#allocation7 + $0x38] sm:$0xff]  }
  0x36   :  { %3199 = vmatpush3.bf16.msra.mxu0 %v3422_v16  ;;  %3224 = vmatprep.subr.bf16.mxu1 %v3747_v1  ;;  %v3454_v60 = vld [vmem:[#allocation4] sm:$0xff]  }
  0x37   :  { %3200 = vmatprep.subr.bf16.mxu0 %v3424_v18  ;;  %v3873_v4 = vld [vmem:[%s4008_s4] ss:$0 sm:$0xff] }
  0x39   :  { %3225 = vmatpush3.bf16.msra.mxu1 %v3423_v19 }
  0x3a   :  { %3201 = vmatpush3.bf16.msra.mxu0 %v3424_v18  ;;  %3226 = vmatprep.subr.bf16.mxu1 %v3747_v1 }
  0x3b   :  { %3202 = vmatprep.subr.bf16.mxu0 %v3426_v20 }
  0x3d   :  { %3227 = vmatpush3.bf16.msra.mxu1 %v3425_v22 }
  0x3e   :  { %3203 = vmatpush3.bf16.msra.mxu0 %v3426_v20  ;;  %3228 = vmatprep.subr.bf16.mxu1 %v3747_v1  ;;  %v3455_v20 = vld [vmem:[#allocation4 + $0x38] sm:$0xff]  }
  0x3f   :  { %3204 = vmatprep.subr.bf16.mxu0 %v3428_v24 }
  0x41   :  { %3229 = vmatpush3.bf16.msra.mxu1 %v3427_v23  ;;  %v3459_v23 = vld [vmem:[#allocation7 + $0x70] sm:$0xff]  }
  0x42   :  { %3205 = vmatpush3.bf16.msra.mxu0 %v3428_v24  ;;  %3230 = vmatprep.subr.bf16.mxu1 %v3747_v1  ;;  %v3457_v24 = vld [vmem:[#allocation4 + $0x30] sm:$0xff]  }
  0x43   :  { %3206 = vmatprep.subr.bf16.mxu0 %v3430_v26 }
  0x45   :  { %3231 = vmatpush3.bf16.msra.mxu1 %v3429_v27  ;;  %v3462_v27 = vld [vmem:[#allocation7 + $0x68] sm:$0xff]  }
  0x46   :  { %3207 = vmatpush3.bf16.msra.mxu0 %v3430_v26  ;;  %3236 = vmatprep.subr.bf16.mxu1 %v3747_v1  ;;  %v3460_v26 = vld [vmem:[#allocation4 + $0x28] sm:$0xff]  }
  0x47   :  { %2941 = vmatprep.subr.bf16.mxu0 %v3431_v28  ;;  %v3463_v28 = vld [vmem:[#allocation4 + $0x20] sm:$0xff]  }
  0x48   :  { %3233 = vmatmul.mubr.bf16.vlgmr.msra.gmra.mxu1 %v3746_v0 }
  0x49   :  { %3237 = vmatpush3.bf16.msra.mxu1 %v3433_v29  ;;  %3252 = vmatprep.mubr.msk.bf16.mxu1 %vm3748_vm0, %v3747_v1  ;;  %v3464_v29 = vld [vmem:[#allocation7 + $0x28] sm:$0xff]  }
  0x4a   :  { %3238 = vmatprep.subr.bf16.mxu1 %v3747_v1 }
  0x4d   :  { %3239 = vmatpush3.bf16.msra.mxu1 %v3436_v30  ;;  %v3465_v30 = vld [vmem:[#allocation7 + $0x60] sm:$0xff]  }
  0x4e   :  { %3240 = vmatprep.subr.bf16.mxu1 %v3747_v1 }
  0x51   :  { %3241 = vmatpush3.bf16.msra.mxu1 %v3439_v45 }
  0x52   :  { %3242 = vmatprep.subr.bf16.mxu1 %v3747_v1 }
  0x55   :  { %3243 = vmatpush3.bf16.msra.mxu1 %v3442_v48 }
  0x56   :  { %3244 = vmatprep.subr.bf16.mxu1 %v3747_v1 }
  0x59   :  { %3245 = vmatpush3.bf16.msra.mxu1 %v3445_v51 }
  0x5a   :  { %3246 = vmatprep.subr.bf16.mxu1 %v3747_v1 }
  0x5d   :  { %3247 = vmatpush3.bf16.msra.mxu1 %v3448_v54 }
  0x5e   :  { %3248 = vmatprep.subr.bf16.mxu1 %v3747_v1 }
  0x61   :  { %3249 = vmatpush3.bf16.msra.mxu1 %v3451_v57 }
  0x62   :  { %3250 = vmatprep.subr.bf16.mxu1 %v3747_v1 }
  0x65   :  { %3251 = vmatpush3.bf16.msra.mxu1 %v3454_v60  ;;  %v3479_v60 = vld [vmem:[#allocation4 + $0x38] sm:$0xff]  }
  0x66   :  { %3256 = vmatprep.subr.bf16.mxu1 %v3747_v1 }
  0xa2   :  { %v84_v31 = vpop.permute.xlu1 %83 }
  0xa3   :  { %v78_v32 = vpop.permute.xlu0 %77  ;;  %vm102_vm1 = vcmp.eq.s32.totalorder %v67_v25, %v84_v31  ;;  %v3466_v31 = vld [vmem:[#allocation4 + $0x18] sm:$0xff]  }
  0xa4   :  { %vm100_vm4 = vcmp.eq.s32.totalorder %v67_v25, %v78_v32  ;;  %v3467_v32 = vld [vmem:[#allocation7 + $0x20] sm:$0xff]  }
  0xa6   :  { %v87_v33 = vpop.permute.xlu1 %86 }
  0xa7   :  { %v81_v34 = vpop.permute.xlu0 %80  ;;  %vm103_vm2 = vcmp.eq.s32.totalorder %v67_v25, %v87_v33  ;;  %v3468_v33 = vld [vmem:[#allocation7 + $0x58] sm:$0xff]  }
  0xa8   :  { %vm101_vm3 = vcmp.eq.s32.totalorder %v67_v25, %v81_v34  ;;  %vm2712_vm5 = vmpackc.low %vm103_vm2, %vm102_vm1  ;;  %v3469_v34 = vld [vmem:[#allocation4 + $0x10] sm:$0xff]  }
  0xa9   :  { %vm2710_vm6 = vmpackc.low %vm101_vm3, %vm100_vm4 }
  0xaa   :  { %3208 = vmatprep.mubr.msk.bf16.mxu0 %vm2710_vm6, %v3749_v37  ;;  %v93_v38 = vpop.permute.xlu1 %92 }
  0xab   :  { %v90_v39 = vpop.permute.xlu0 %89  ;;  %vm105_vm7 = vcmp.eq.s32.totalorder %v67_v25, %v93_v38  ;;  %3209 = vmatmul.mubr.msk.bf16.vlgmr.msra.gmra.mxu0 %vm2712_vm5, %v3749_v37  ;;  %v3473_v38 = vld [vmem:[#allocation7 + $0x10] sm:$0xff]  }
  0xac   :  { %vm104_vm8 = vcmp.eq.s32.totalorder %v67_v25, %v90_v39  ;;  %2942 = vmatpush3.bf16.msra.mxu0 %v3432_v35  ;;  %v3470_v35 = vld [vmem:[#allocation7 + $0x18] sm:$0xff]   ;;  %v3474_v39 = vld [vmem:[#allocation7 + $0x48] sm:$0xff]  }
  0xad   :  { %vm2714_vm9 = vmpackc.low %vm105_vm7, %vm104_vm8  ;;  %2943 = vmatprep.subr.bf16.mxu0 %v3434_v36  ;;  %v3471_v36 = vld [vmem:[#allocation7 + $0x50] sm:$0xff]  }
  0xae   :  { %3212 = vmatprep.mubr.msk.bf16.mxu0 %vm2714_vm9, %v3749_v37  ;;  %v99_v42 = vpop.permute.xlu1 %98 }
  0xaf   :  { %v96_v43 = vpop.permute.xlu0 %95  ;;  %vm107_vm10 = vcmp.eq.s32.totalorder %v67_v25, %v99_v42  ;;  %v3477_v42 = vld [vmem:[#allocation7 + $0x40] sm:$0xff]  }
  0xb0   :  { %vm106_vm11 = vcmp.eq.s32.totalorder %v67_v25, %v96_v43  ;;  %2944 = vmatpush3.bf16.msra.mxu0 %v3435_v40  ;;  %v3461_v25 = vld [vmem:[#allocation7 + $0x30] sm:$0xff]   ;;  %v3475_v40 = vld [vmem:[#allocation4] sm:$0xff]  }
  0xb1   :  { %vm2716_vm12 = vmpackc.low %vm107_vm10, %vm106_vm11  ;;  %2945 = vmatprep.subr.bf16.mxu0 %v3437_v41  ;;  %v3476_v41 = vld [vmem:[#allocation7 + $0x8] sm:$0xff]   ;;  %v3478_v43 = vld [vmem:[#allocation7] sm:$0xff]  }
  0xb3   :  { %3213 = vmatmul.mubr.msk.bf16.gmra.mxu0 %vm2716_vm12, %v3749_v37  ;;  %v3472_v37 = vld [vmem:[#allocation4 + $0x8] sm:$0xff]  }
  0xb4   :  { %2946 = vmatpush3.bf16.msra.mxu0 %v3438_v44  ;;  %549 = vmatprep.mubr.bf16.mxu0 %v3750_v61  ;;  %v3482_v44 = vld [vmem:[#allocation7 + $0x78] sm:$0xff]  }
  0xb5   :  { %2947 = vmatprep.subr.bf16.mxu0 %v3440_v46 }
  0xb8   :  { %2948 = vmatpush3.bf16.msra.mxu0 %v3441_v47 }
  0xb9   :  { %2949 = vmatprep.subr.bf16.mxu0 %v3443_v49 }
  0xbc   :  { %2950 = vmatpush3.bf16.msra.mxu0 %v3444_v50  ;;  %v3910_v50 = vld [vmem:[%s4008_s4 + $0x1] ss:$0 sm:$0xff]  ;;  %s3751_s4 = smov [#allocation10]  }
  0xbd   :  { %2951 = vmatprep.subr.bf16.mxu0 %v3446_v52  ;;  %s2680_s18 = sshll.u32 %s3751_s4, 4  ;;  %s2681_s18 = int_to_ptr.vmem [resolvable:$true] %s2680_s18 }
  0xbe   :  { %s3715_s19 = scalar_lea.vmem %s2681_s18, 1024  ;;  %p3720_p2 = scmp.lt.s32.totalorder %s2681_s18, %s2681_s18 }
  0xbf   :  { %p3716_p1 = scmp.ne.s32.totalorder %s2681_s18, %s3715_s19  ;;  %p3721_p3 = scmp.lt.s32.totalorder %s3715_s19, %s3715_s19 }
  0xc0   :  { %2952 = vmatpush3.bf16.msra.mxu0 %v3447_v53 }
  0xc1   :  { %2953 = vmatprep.subr.bf16.mxu0 %v3449_v55  ;;  %p3722_p4 = por %p3721_p3, %p3720_p2 }
  0xc3   :  { %p3723_p5 = pnand %p3722_p4, %p3716_p1 }
  0xc4   :  { %2954 = vmatpush3.bf16.msra.mxu0 %v3450_v56 }
  0xc5   :  { %2955 = vmatprep.subr.bf16.mxu0 %v3452_v58 }
  0xc8   :  { %2956 = vmatpush3.bf16.msra.mxu0 %v3453_v59 }
  0xc9   :  { %2972 = vmatprep.subr.bf16.mxu0 %v3456_v62 }
 0x108   :  { %v379_v63 = vpop.f32.mrf.mxu1 }
 0x10a   :  { %v3234_v0 = vpop.f32.mrf.mxu1 }
 0x10c   :  { %v382_v2 = vpop.f32.mrf.mxu1 }
 0x10d   :  { %v3483_v2 = vld [vmem:[#allocation7 + $0x38] sm:$0xff]  }
 0x10e   :  { %v3235_v3 = vpop.f32.mrf.mxu1 }
 0x10f   :  { %v3481_v3 = vld [vmem:[#allocation4 + $0x28] sm:$0xff]  }
 0x16b   :  { %v3210_v5 = vpop.f32.mrf.mxu0 }
 0x16c   :  { %v3876_v6 = vadd.f32 %v3210_v5, %v3873_v4  ;;  %v3484_v5 = vld [vmem:[#allocation4 + $0x20] sm:$0xff]  }
 0x16d   :  { %v233_v7 = vpop.f32.mrf.mxu0 }
 0x16e   :  { %v234_v8 = vadd.f32 %v3873_v4, %v233_v7  ;;  %v3485_v7 = vld [vmem:[#allocation7 + $0x70] sm:$0xff]  }
 0x16f   :  { %v3211_v9 = vpop.f32.mrf.mxu0 }
 0x170   :  { %v385_v10 = vadd.f32 %v379_v63, %v234_v8  ;;  %v3880_v11 = vadd.f32 %v3211_v9, %v3873_v4  ;;  %v3480_v63 = vld [vmem:[#allocation4 + $0x30] sm:$0xff]   ;;  %v3487_v9 = vld [vmem:[#allocation4 + $0x18] sm:$0xff]  }
 0x171   :  { %v3882_v12 = vpop.f32.mrf.mxu0  ;;  %v3486_v8 = vld [vmem:[#allocation7 + $0x30] sm:$0xff]  }
 0x172   :  { %3623 = vtanh.f32 %v385_v10  ;;  %v237_v46 = vadd.f32 %v3873_v4, %v3882_v12  ;;  %v3488_v10 = vld [vmem:[#allocation7 + $0x68] sm:$0xff]  }
 0x173   :  { %v3214_v13 = vpop.f32.mrf.mxu0  ;;  %v3489_v12 = vld [vmem:[#allocation7 + $0x28] sm:$0xff]  }
 0x174   :  { %v3885_v14 = vadd.f32 %v3214_v13, %v3873_v4  ;;  %v3490_v13 = vld [vmem:[#allocation4 + $0x10] sm:$0xff]  }
 0x175   :  { %v249_v15 = vpop.f32.mrf.mxu0 }
 0x176   :  { %v3888_v16 = vadd.f32 %v3873_v4, %v249_v15  ;;  %v3491_v15 = vld [vmem:[#allocation7 + $0x60] sm:$0xff]  }
 0x177   :  { %v3215_v17 = vpop.f32.mrf.mxu0 }
 0x178   :  { %v3891_v18 = vadd.f32 %v3215_v17, %v3873_v4  ;;  %v3492_v17 = vld [vmem:[#allocation7 + $0x20] sm:$0xff]  }
 0x179   :  { %v3903_v45 = vpop.f32.mrf.mxu0 }
 0x17f   :  { %v3624_v19 = vpop.eup %3623 }
 0x180   :  { %v387_v22 = vpack.c.bf16 %v3624_v19, %v3624_v19  ;;  %v3493_v19 = vld [vmem:[#allocation4 + $0x8] sm:$0xff]  }
 0x182   :  { %550 = vmatmul.mubr.bf16.vlgmr.msra.gmra.mxu0 %v387_v22  ;;  %3253 = vmatmul.mubr.bf16.vlgmr.msra.gmra.mxu1 %v387_v22  ;;  %v3496_v22 = vld [vmem:[#allocation4] sm:$0xff]  }
 0x183   :  { %3257 = vmatpush3.bf16.msra.mxu1 %v3455_v20  ;;  %2973 = vmatpush3.bf16.msra.mxu0 %v3458_v21  ;;  %v3494_v20 = vld [vmem:[#allocation7 + $0x58] sm:$0xff]  }
 0x184   :  { %3258 = vmatprep.subr.bf16.mxu1 %v3747_v1  ;;  %2974 = vmatprep.subr.bf16.mxu0 %v3459_v23  ;;  %v3495_v21 = vld [vmem:[#allocation7 + $0x18] sm:$0xff]   ;;  %v3497_v23 = vld [vmem:[#allocation7 + $0x50] sm:$0xff]  }
 0x185   :  { %3272 = vmatprep.mubr.msk.bf16.mxu1 %vm3748_vm0, %v3747_v1 }
 0x187   :  { %3259 = vmatpush3.bf16.msra.mxu1 %v3457_v24  ;;  %2975 = vmatpush3.bf16.msra.mxu0 %v3461_v25  ;;  %v3498_v24 = vld [vmem:[#allocation7 + $0x10] sm:$0xff]   ;;  %v3499_v25 = vld [vmem:[#allocation7 + $0x48] sm:$0xff]  }
 0x188   :  { %3260 = vmatprep.subr.bf16.mxu1 %v3747_v1  ;;  %2976 = vmatprep.subr.bf16.mxu0 %v3462_v27  ;;  %v3501_v27 = vld [vmem:[#allocation7 + $0x40] sm:$0xff]  }
 0x18b   :  { %3261 = vmatpush3.bf16.msra.mxu1 %v3460_v26  ;;  %2977 = vmatpush3.bf16.msra.mxu0 %v3464_v29  ;;  %v3500_v26 = vld [vmem:[#allocation7 + $0x8] sm:$0xff]  }
 0x18c   :  { %3262 = vmatprep.subr.bf16.mxu1 %v3747_v1  ;;  %2978 = vmatprep.subr.bf16.mxu0 %v3465_v30 }
 0x18f   :  { %3263 = vmatpush3.bf16.msra.mxu1 %v3463_v28  ;;  %2979 = vmatpush3.bf16.msra.mxu0 %v3467_v32  ;;  %v3502_v28 = vld [vmem:[#allocation7] sm:$0xff]  }
 0x190   :  { %3264 = vmatprep.subr.bf16.mxu1 %v3747_v1  ;;  %2980 = vmatprep.subr.bf16.mxu0 %v3468_v33 }
 0x193   :  { %3265 = vmatpush3.bf16.msra.mxu1 %v3466_v31  ;;  %2981 = vmatpush3.bf16.msra.mxu0 %v3470_v35 }
 0x194   :  { %3266 = vmatprep.subr.bf16.mxu1 %v3747_v1  ;;  %2982 = vmatprep.subr.bf16.mxu0 %v3471_v36 }
 0x197   :  { %3267 = vmatpush3.bf16.msra.mxu1 %v3469_v34  ;;  %2983 = vmatpush3.bf16.msra.mxu0 %v3473_v38 }
 0x198   :  { %3268 = vmatprep.subr.bf16.mxu1 %v3747_v1  ;;  %2984 = vmatprep.subr.bf16.mxu0 %v3474_v39 }
 0x19b   :  { %3269 = vmatpush3.bf16.msra.mxu1 %v3472_v37  ;;  %2985 = vmatpush3.bf16.msra.mxu0 %v3476_v41  ;;  %v3503_v41 = vld [vmem:[#allocation4 + $0x38] sm:$0xff]  }
 0x19c   :  { %3270 = vmatprep.subr.bf16.mxu1 %v3747_v1  ;;  %2986 = vmatprep.subr.bf16.mxu0 %v3477_v42 }
 0x19f   :  { %3271 = vmatpush3.bf16.msra.mxu1 %v3475_v40  ;;  %2987 = vmatpush3.bf16.msra.mxu0 %v3478_v43  ;;  %v3504_v43 = vld [vmem:[#allocation4 + $0x30] sm:$0xff]  }
 0x1a0   :  { %3276 = vmatprep.subr.bf16.mxu1 %v3747_v1  ;;  %3003 = vmatprep.subr.bf16.mxu0 %v3482_v44 }
 0x242   :  { %v2957_v47 = vpop.f32.mrf.mxu0  ;;  %v659_v48 = vpop.f32.mrf.mxu1 }
 0x243   :  { %v665_v49 = vadd.f32 %v659_v48, %v237_v46  ;;  %v3507_v48 = vld [vmem:[#allocation7 + $0x78] sm:$0xff]  }
 0x244   :  { %v2958_v51 = vpop.f32.mrf.mxu0  ;;  %v3254_v52 = vpop.f32.mrf.mxu1 }
 0x245   :  { %3625 = vtanh.f32 %v665_v49  ;;  %v2959_v53 = vadd.f32 %v2958_v51, %v2957_v47  ;;  %v3506_v47 = vld [vmem:[#allocation4 + $0x20] sm:$0xff]   ;;  %v3508_v49 = vld [vmem:[#allocation7 + $0x38] sm:$0xff]   ;;  %v3510_v52 = vld [vmem:[#allocation7 + $0x70] sm:$0xff]  }
 0x246   :  { %v2960_v54 = vpop.f32.mrf.mxu0  ;;  %v662_v55 = vpop.f32.mrf.mxu1  ;;  %v3509_v51 = vld [vmem:[#allocation4 + $0x18] sm:$0xff]  }
 0x247   :  { %v552_v56 = vadd.f32 %v2959_v53, %v3910_v50  ;;  %v3511_v53 = vld [vmem:[#allocation7 + $0x30] sm:$0xff]   ;;  %v3513_v55 = vld [vmem:[#allocation7 + $0x68] sm:$0xff]  }
 0x248   :  { %v2961_v57 = vpop.f32.mrf.mxu0  ;;  %v3255_v58 = vpop.f32.mrf.mxu1  ;;  %v3512_v54 = vld [vmem:[#allocation4 + $0x10] sm:$0xff]  }
 0x249   :  { %3627 = vtanh.f32 %v552_v56  ;;  %v3514_v56 = vld [vmem:[#allocation7 + $0x28] sm:$0xff]   ;;  %v3516_v58 = vld [vmem:[#allocation7 + $0x60] sm:$0xff]  }
 0x24a   :  { %v3515_v57 = vld [vmem:[#allocation4 + $0x8] sm:$0xff]  }
 0x252   :  { %v3626_v59 = vpop.eup %3625 }
 0x253   :  { %v667_v61 = vpack.c.bf16 %v3626_v59, %v3626_v59  ;;  %v3517_v59 = vld [vmem:[#allocation7 + $0x20] sm:$0xff]  }
 0x255   :  { %3273 = vmatmul.mubr.bf16.vlgmr.msra.gmra.mxu1 %v667_v61 }
 0x256   :  { %v3913_v62 = vpop.eup %3627  ;;  %3277 = vmatpush3.bf16.msra.mxu1 %v3479_v60  ;;  %3292 = vmatprep.mubr.msk.bf16.mxu1 %vm3748_vm0, %v3747_v1  ;;  %v3518_v60 = vld [vmem:[#allocation4] sm:$0xff]  }
 0x257   :  { %v668_v0 = vpack.c.bf16 %v3913_v62, %v3913_v62  ;;  %3278 = vmatprep.subr.bf16.mxu1 %v3747_v1 }
 0x259   :  { %829 = vmatprep.mubr.bf16.mxu0 %v668_v0  ;;  %v3521_v0 = vld [vmem:[#allocation7 + $0x50] sm:$0xff]  }
 0x25a   :  { %830 = vmatmul.mubr.bf16.vlgmr.msra.gmra.mxu0 %v667_v61  ;;  %3279 = vmatpush3.bf16.msra.mxu1 %v3480_v63  ;;  %v3519_v61 = vld [vmem:[#allocation7 + $0x58] sm:$0xff]  }
 0x25b   :  { %3280 = vmatprep.subr.bf16.mxu1 %v3747_v1  ;;  %3004 = vmatpush3.bf16.msra.mxu0 %v3483_v2  ;;  %v3520_v63 = vld [vmem:[#allocation7 + $0x18] sm:$0xff]   ;;  %v3522_v2 = vld [vmem:[#allocation7 + $0x10] sm:$0xff]  }
 0x25c   :  { %3005 = vmatprep.subr.bf16.mxu0 %v3485_v7  ;;  %v3525_v7 = vld [vmem:[#allocation7 + $0x40] sm:$0xff]  }
 0x25e   :  { %3281 = vmatpush3.bf16.msra.mxu1 %v3481_v3  ;;  %v3523_v3 = vld [vmem:[#allocation7 + $0x48] sm:$0xff]  }
 0x25f   :  { %3282 = vmatprep.subr.bf16.mxu1 %v3747_v1  ;;  %3006 = vmatpush3.bf16.msra.mxu0 %v3486_v8  ;;  %v3526_v8 = vld [vmem:[#allocation7] sm:$0xff]  }
 0x260   :  { %3007 = vmatprep.subr.bf16.mxu0 %v3488_v10 }
 0x262   :  { %3283 = vmatpush3.bf16.msra.mxu1 %v3484_v5  ;;  %v3524_v5 = vld [vmem:[#allocation7 + $0x8] sm:$0xff]  }
 0x263   :  { %3284 = vmatprep.subr.bf16.mxu1 %v3747_v1  ;;  %3008 = vmatpush3.bf16.msra.mxu0 %v3489_v12 }
 0x264   :  { %3009 = vmatprep.subr.bf16.mxu0 %v3491_v15 }
 0x266   :  { %3285 = vmatpush3.bf16.msra.mxu1 %v3487_v9 }
 0x267   :  { %3286 = vmatprep.subr.bf16.mxu1 %v3747_v1  ;;  %3010 = vmatpush3.bf16.msra.mxu0 %v3492_v17 }
 0x268   :  { %3011 = vmatprep.subr.bf16.mxu0 %v3494_v20 }
 0x26a   :  { %3287 = vmatpush3.bf16.msra.mxu1 %v3490_v13 }
 0x26b   :  { %3288 = vmatprep.subr.bf16.mxu1 %v3747_v1  ;;  %3012 = vmatpush3.bf16.msra.mxu0 %v3495_v21 }
 0x26c   :  { %3013 = vmatprep.subr.bf16.mxu0 %v3497_v23 }
 0x26e   :  { %3289 = vmatpush3.bf16.msra.mxu1 %v3493_v19 }
 0x26f   :  { %3290 = vmatprep.subr.bf16.mxu1 %v3747_v1  ;;  %3014 = vmatpush3.bf16.msra.mxu0 %v3498_v24 }
 0x270   :  { %3015 = vmatprep.subr.bf16.mxu0 %v3499_v25  ;;  %v3527_v25 = vld [vmem:[#allocation4 + $0x38] sm:$0xff]  }
 0x272   :  { %3291 = vmatpush3.bf16.msra.mxu1 %v3496_v22 }
 0x273   :  { %3296 = vmatprep.subr.bf16.mxu1 %v3747_v1  ;;  %3016 = vmatpush3.bf16.msra.mxu0 %v3500_v26 }
 0x274   :  { %3017 = vmatprep.subr.bf16.mxu0 %v3501_v27  ;;  %v3528_v27 = vld [vmem:[#allocation4 + $0x30] sm:$0xff]  }
 0x277   :  { %3018 = vmatpush3.bf16.msra.mxu0 %v3502_v28 }
 0x278   :  { %3034 = vmatprep.subr.bf16.mxu0 %v3507_v48  ;;  %v3547_v48 = vld [vmem:[#allocation7 + $0x48] sm:$0xff]  }
 0x315   :  { %v940_v29 = vpop.f32.mrf.mxu1 }
 0x316   :  { %v946_v30 = vadd.f32 %v940_v29, %v3876_v6  ;;  %v3505_v6 = vld [vmem:[#allocation4 + $0x28] sm:$0xff]  }
 0x317   :  { %v3274_v31 = vpop.f32.mrf.mxu1 }
 0x318   :  { %3629 = vtanh.f32 %v946_v30  ;;  %v3530_v30 = vld [vmem:[#allocation4 + $0x20] sm:$0xff]   ;;  %v3531_v31 = vld [vmem:[#allocation4 + $0x18] sm:$0xff]  }
 0x319   :  { %v943_v32 = vpop.f32.mrf.mxu1 }
 0x31a   :  { %v2988_v33 = vpop.f32.mrf.mxu0  ;;  %v3532_v32 = vld [vmem:[#allocation7 + $0x78] sm:$0xff]  }
 0x31b   :  { %v3275_v34 = vpop.f32.mrf.mxu1 }
 0x31c   :  { %v2989_v35 = vpop.f32.mrf.mxu0  ;;  %v3534_v34 = vld [vmem:[#allocation4 + $0x10] sm:$0xff]  }
 0x31d   :  { %v2990_v36 = vadd.f32 %v2989_v35, %v2988_v33  ;;  %v3533_v33 = vld [vmem:[#allocation7 + $0x38] sm:$0xff]   ;;  %v3535_v35 = vld [vmem:[#allocation7 + $0x70] sm:$0xff]  }
 0x31e   :  { %v2991_v37 = vpop.f32.mrf.mxu0 }
 0x31f   :  { %v832_v38 = vadd.f32 %v2990_v36, %v3910_v50  ;;  %v3536_v36 = vld [vmem:[#allocation7 + $0x30] sm:$0xff]   ;;  %v3537_v37 = vld [vmem:[#allocation4 + $0x8] sm:$0xff]  }
 0x320   :  { %v2992_v39 = vpop.f32.mrf.mxu0 }
 0x321   :  { %3631 = vtanh.f32 %v832_v38  ;;  %v3538_v38 = vld [vmem:[#allocation7 + $0x68] sm:$0xff]  }
 0x322   :  { %v3539_v39 = vld [vmem:[#allocation7 + $0x28] sm:$0xff]  }
 0x325   :  { %v3630_v40 = vpop.eup %3629 }
 0x326   :  { %v948_v42 = vpack.c.bf16 %v3630_v40, %v3630_v40  ;;  %v3540_v40 = vld [vmem:[#allocation4] sm:$0xff]  }
 0x328   :  { %3293 = vmatmul.mubr.bf16.vlgmr.msra.gmra.mxu1 %v948_v42 }
 0x329   :  { %3297 = vmatpush3.bf16.msra.mxu1 %v3503_v41  ;;  %3312 = vmatprep.mubr.msk.bf16.mxu1 %vm3748_vm0, %v3747_v1  ;;  %v3541_v41 = vld [vmem:[#allocation7 + $0x60] sm:$0xff]  }
 0x32a   :  { %3298 = vmatprep.subr.bf16.mxu1 %v3747_v1 }
 0x32d   :  { %3299 = vmatpush3.bf16.msra.mxu1 %v3504_v43  ;;  %v3543_v43 = vld [vmem:[#allocation7 + $0x58] sm:$0xff]  }
 0x32e   :  { %v3932_v44 = vpop.eup %3631  ;;  %3300 = vmatprep.subr.bf16.mxu1 %v3747_v1 }
 0x32f   :  { %v949_v46 = vpack.c.bf16 %v3932_v44, %v3932_v44 }
 0x331   :  { %1110 = vmatprep.mubr.bf16.mxu0 %v949_v46  ;;  %3301 = vmatpush3.bf16.msra.mxu1 %v3505_v6  ;;  %v3544_v6 = vld [vmem:[#allocation7 + $0x18] sm:$0xff]   ;;  %v3545_v46 = vld [vmem:[#allocation7 + $0x50] sm:$0xff]  }
 0x332   :  { %1111 = vmatmul.mubr.bf16.vlgmr.msra.gmra.mxu0 %v948_v42  ;;  %3302 = vmatprep.subr.bf16.mxu1 %v3747_v1  ;;  %v3542_v42 = vld [vmem:[#allocation7 + $0x20] sm:$0xff]  }
 0x333   :  { %3035 = vmatpush3.bf16.msra.mxu0 %v3508_v49  ;;  %v3548_v49 = vld [vmem:[#allocation7 + $0x8] sm:$0xff]  }
 0x334   :  { %3036 = vmatprep.subr.bf16.mxu0 %v3510_v52  ;;  %v3550_v52 = vld [vmem:[#allocation7] sm:$0xff]  }
 0x335   :  { %3303 = vmatpush3.bf16.msra.mxu1 %v3506_v47  ;;  %v3546_v47 = vld [vmem:[#allocation7 + $0x10] sm:$0xff]  }
 0x336   :  { %3304 = vmatprep.subr.bf16.mxu1 %v3747_v1 }
 0x337   :  { %3037 = vmatpush3.bf16.msra.mxu0 %v3511_v53 }
 0x338   :  { %3038 = vmatprep.subr.bf16.mxu0 %v3513_v55 }
 0x339   :  { %3305 = vmatpush3.bf16.msra.mxu1 %v3509_v51  ;;  %v3549_v51 = vld [vmem:[#allocation7 + $0x40] sm:$0xff]  }
 0x33a   :  { %3306 = vmatprep.subr.bf16.mxu1 %v3747_v1 }
 0x33b   :  { %3039 = vmatpush3.bf16.msra.mxu0 %v3514_v56 }
 0x33c   :  { %3040 = vmatprep.subr.bf16.mxu0 %v3516_v58 }
 0x33d   :  { %3307 = vmatpush3.bf16.msra.mxu1 %v3512_v54 }
 0x33e   :  { %3308 = vmatprep.subr.bf16.mxu1 %v3747_v1 }
 0x33f   :  { %3041 = vmatpush3.bf16.msra.mxu0 %v3517_v59 }
 0x340   :  { %3042 = vmatprep.subr.bf16.mxu0 %v3519_v61 }
 0x341   :  { %3309 = vmatpush3.bf16.msra.mxu1 %v3515_v57 }
 0x342   :  { %3310 = vmatprep.subr.bf16.mxu1 %v3747_v1 }
 0x343   :  { %3043 = vmatpush3.bf16.msra.mxu0 %v3520_v63 }
 0x344   :  { %3044 = vmatprep.subr.bf16.mxu0 %v3521_v0 }
 0x345   :  { %3311 = vmatpush3.bf16.msra.mxu1 %v3518_v60  ;;  %v3551_v60 = vld [vmem:[#allocation4 + $0x38] sm:$0xff]  }
 0x346   :  { %3316 = vmatprep.subr.bf16.mxu1 %v3747_v1 }
 0x347   :  { %3045 = vmatpush3.bf16.msra.mxu0 %v3522_v2 }
 0x348   :  { %3046 = vmatprep.subr.bf16.mxu0 %v3523_v3 }
 0x34b   :  { %3047 = vmatpush3.bf16.msra.mxu0 %v3524_v5  ;;  %v3552_v5 = vld [vmem:[#allocation4 + $0x30] sm:$0xff]  }
 0x34c   :  { %3048 = vmatprep.subr.bf16.mxu0 %v3525_v7  ;;  %v3553_v7 = vld [vmem:[#allocation4 + $0x28] sm:$0xff]  }
 0x34f   :  { %3049 = vmatpush3.bf16.msra.mxu0 %v3526_v8 }
 0x350   :  { %3065 = vmatprep.subr.bf16.mxu0 %v3532_v32  ;;  %v3572_v32 = vld [vmem:[#allocation7 + $0x8] sm:$0xff]  }
 0x3e8   :  { %v1221_v9 = vpop.f32.mrf.mxu1 }
 0x3e9   :  { %v1227_v10 = vadd.f32 %v1221_v9, %v3880_v11  ;;  %v3529_v11 = vld [vmem:[#allocation4 + $0x28] sm:$0xff]  }
 0x3ea   :  { %v3294_v12 = vpop.f32.mrf.mxu1 }
 0x3eb   :  { %3633 = vtanh.f32 %v1227_v10  ;;  %v3554_v10 = vld [vmem:[#allocation4 + $0x20] sm:$0xff]   ;;  %v3555_v12 = vld [vmem:[#allocation4 + $0x18] sm:$0xff]  }
 0x3ec   :  { %v1224_v13 = vpop.f32.mrf.mxu1 }
 0x3ed   :  { %v3556_v13 = vld [vmem:[#allocation4 + $0x10] sm:$0xff]  }
 0x3ee   :  { %v3295_v15 = vpop.f32.mrf.mxu1 }
 0x3ef   :  { %v3557_v15 = vld [vmem:[#allocation7 + $0x78] sm:$0xff]  }
 0x3f2   :  { %v3019_v17 = vpop.f32.mrf.mxu0 }
 0x3f4   :  { %v3020_v19 = vpop.f32.mrf.mxu0 }
 0x3f5   :  { %v3021_v20 = vadd.f32 %v3020_v19, %v3019_v17  ;;  %v3558_v17 = vld [vmem:[#allocation4 + $0x8] sm:$0xff]   ;;  %v3559_v19 = vld [vmem:[#allocation7 + $0x38] sm:$0xff]  }
 0x3f6   :  { %v3022_v21 = vpop.f32.mrf.mxu0 }
 0x3f7   :  { %v1113_v22 = vadd.f32 %v3021_v20, %v3910_v50  ;;  %v3560_v20 = vld [vmem:[#allocation7 + $0x70] sm:$0xff]   ;;  %v3561_v21 = vld [vmem:[#allocation4] sm:$0xff]  }
 0x3f8   :  { %v3634_v23 = vpop.eup %3633  ;;  %v3023_v24 = vpop.f32.mrf.mxu0 }
 0x3f9   :  { %v1229_v26 = vpack.c.bf16 %v3634_v23, %v3634_v23  ;;  %3635 = vtanh.f32 %v1113_v22  ;;  %v3562_v22 = vld [vmem:[#allocation7 + $0x30] sm:$0xff]   ;;  %v3563_v23 = vld [vmem:[#allocation7 + $0x68] sm:$0xff]  }
 0x3fa   :  { %v3564_v24 = vld [vmem:[#allocation7 + $0x28] sm:$0xff]  }
 0x3fb   :  { %3313 = vmatmul.mubr.bf16.vlgmr.msra.gmra.mxu1 %v1229_v26 }
 0x3fc   :  { %3317 = vmatpush3.bf16.msra.mxu1 %v3527_v25  ;;  %3332 = vmatprep.mubr.msk.bf16.mxu1 %vm3748_vm0, %v3747_v1  ;;  %v3565_v25 = vld [vmem:[#allocation7 + $0x60] sm:$0xff]  }
 0x3fd   :  { %3318 = vmatprep.subr.bf16.mxu1 %v3747_v1 }
 0x400   :  { %3319 = vmatpush3.bf16.msra.mxu1 %v3528_v27  ;;  %v3567_v27 = vld [vmem:[#allocation7 + $0x58] sm:$0xff]  }
 0x401   :  { %3320 = vmatprep.subr.bf16.mxu1 %v3747_v1 }
 0x404   :  { %3321 = vmatpush3.bf16.msra.mxu1 %v3529_v11  ;;  %v3568_v11 = vld [vmem:[#allocation7 + $0x18] sm:$0xff]  }
 0x405   :  { %3322 = vmatprep.subr.bf16.mxu1 %v3747_v1 }
 0x406   :  { %v3950_v28 = vpop.eup %3635 }
 0x407   :  { %v1230_v29 = vpack.c.bf16 %v3950_v28, %v3950_v28 }
 0x408   :  { %3323 = vmatpush3.bf16.msra.mxu1 %v3530_v30  ;;  %v3570_v30 = vld [vmem:[#allocation7 + $0x10] sm:$0xff]  }
 0x409   :  { %1391 = vmatprep.mubr.bf16.mxu0 %v1230_v29  ;;  %3324 = vmatprep.subr.bf16.mxu1 %v3747_v1  ;;  %v3569_v29 = vld [vmem:[#allocation7 + $0x50] sm:$0xff]  }
 0x40a   :  { %1392 = vmatmul.mubr.bf16.vlgmr.msra.gmra.mxu0 %v1229_v26  ;;  %v3566_v26 = vld [vmem:[#allocation7 + $0x20] sm:$0xff]  }
 0x40b   :  { %3066 = vmatpush3.bf16.msra.mxu0 %v3533_v33  ;;  %v3573_v33 = vld [vmem:[#allocation7 + $0x40] sm:$0xff]  }
 0x40c   :  { %3325 = vmatpush3.bf16.msra.mxu1 %v3531_v31  ;;  %3067 = vmatprep.subr.bf16.mxu0 %v3535_v35  ;;  %v3571_v31 = vld [vmem:[#allocation7 + $0x48] sm:$0xff]   ;;  %v253_v35 = vadd.f32 %v3873_v4, %v3903_v45 }
 0x40d   :  { %3326 = vmatprep.subr.bf16.mxu1 %v3747_v1 }
 0x40f   :  { %3068 = vmatpush3.bf16.msra.mxu0 %v3536_v36 }
 0x410   :  { %3327 = vmatpush3.bf16.msra.mxu1 %v3534_v34  ;;  %3069 = vmatprep.subr.bf16.mxu0 %v3538_v38  ;;  %v3574_v34 = vld [vmem:[#allocation7] sm:$0xff]  }
 0x411   :  { %3328 = vmatprep.subr.bf16.mxu1 %v3747_v1 }
 0x413   :  { %3070 = vmatpush3.bf16.msra.mxu0 %v3539_v39 }
 0x414   :  { %3329 = vmatpush3.bf16.msra.mxu1 %v3537_v37  ;;  %3071 = vmatprep.subr.bf16.mxu0 %v3541_v41 }
 0x415   :  { %3330 = vmatprep.subr.bf16.mxu1 %v3747_v1 }
 0x417   :  { %3072 = vmatpush3.bf16.msra.mxu0 %v3542_v42  ;;  %v3575_v42 = vld [vmem:[#allocation4 + $0x38] sm:$0xff]  }
 0x418   :  { %3331 = vmatpush3.bf16.msra.mxu1 %v3540_v40  ;;  %3073 = vmatprep.subr.bf16.mxu0 %v3543_v43 }
 0x419   :  { %3336 = vmatprep.subr.bf16.mxu1 %v3747_v1 }
 0x41b   :  { %3074 = vmatpush3.bf16.msra.mxu0 %v3544_v6 }
 0x41c   :  { %3075 = vmatprep.subr.bf16.mxu0 %v3545_v46  ;;  %v3576_v46 = vld [vmem:[#allocation4 + $0x30] sm:$0xff]  }
 0x41f   :  { %3076 = vmatpush3.bf16.msra.mxu0 %v3546_v47 }
 0x420   :  { %3077 = vmatprep.subr.bf16.mxu0 %v3547_v48  ;;  %v3577_v48 = vld [vmem:[#allocation4 + $0x28] sm:$0xff]  }
 0x423   :  { %3078 = vmatpush3.bf16.msra.mxu0 %v3548_v49 }
 0x424   :  { %3079 = vmatprep.subr.bf16.mxu0 %v3549_v51 }
 0x427   :  { %3080 = vmatpush3.bf16.msra.mxu0 %v3550_v52  ;;  %v3578_v52 = vld [vmem:[#allocation4 + $0x20] sm:$0xff]  }
 0x428   :  { %3096 = vmatprep.subr.bf16.mxu0 %v3557_v15  ;;  %v3604_v15 = vld [vmem:[#allocation7 + $0x40] sm:$0xff]  }
 0x4bb   :  { %v1502_v53 = vpop.f32.mrf.mxu1 }
 0x4bc   :  { %v1508_v54 = vadd.f32 %v1502_v53, %v3888_v16 }
 0x4bd   :  { %v3314_v55 = vpop.f32.mrf.mxu1 }
 0x4be   :  { %3637 = vtanh.f32 %v1508_v54  ;;  %v3579_v55 = vld [vmem:[#allocation4 + $0x18] sm:$0xff]  }
 0x4bf   :  { %v1505_v56 = vpop.f32.mrf.mxu1 }
 0x4c0   :  { %v3580_v56 = vld [vmem:[#allocation4 + $0x10] sm:$0xff]  }
 0x4c1   :  { %v3315_v57 = vpop.f32.mrf.mxu1 }
 0x4c2   :  { %v3581_v57 = vld [vmem:[#allocation4 + $0x8] sm:$0xff]  }
 0x4ca   :  { %v3050_v58 = vpop.f32.mrf.mxu0 }
 0x4cb   :  { %v3638_v59 = vpop.eup %3637 }
 0x4cc   :  { %v1510_v61 = vpack.c.bf16 %v3638_v59, %v3638_v59  ;;  %v3051_v63 = vpop.f32.mrf.mxu0  ;;  %v3583_v59 = vld [vmem:[#allocation7 + $0x78] sm:$0xff]  }
 0x4cd   :  { %v3052_v0 = vadd.f32 %v3051_v63, %v3050_v58  ;;  %v3582_v58 = vld [vmem:[#allocation4] sm:$0xff]   ;;  %v3586_v63 = vld [vmem:[#allocation7 + $0x70] sm:$0xff]  }
 0x4ce   :  { %v3053_v2 = vpop.f32.mrf.mxu0  ;;  %3333 = vmatmul.mubr.bf16.vlgmr.msra.gmra.mxu1 %v1510_v61 }
 0x4cf   :  { %v1394_v3 = vadd.f32 %v3052_v0, %v3910_v50  ;;  %3337 = vmatpush3.bf16.msra.mxu1 %v3551_v60  ;;  %3352 = vmatprep.mubr.msk.bf16.mxu1 %vm3748_vm0, %v3747_v1  ;;  %v3584_v60 = vld [vmem:[#allocation7 + $0x38] sm:$0xff]   ;;  %v3587_v0 = vld [vmem:[#allocation7 + $0x30] sm:$0xff]   ;;  %v3589_v2 = vld [vmem:[#allocation7 + $0x68] sm:$0xff]  }
 0x4d0   :  { %v3054_v16 = vpop.f32.mrf.mxu0  ;;  %3338 = vmatprep.subr.bf16.mxu1 %v3747_v1 }
 0x4d1   :  { %3639 = vtanh.f32 %v1394_v3  ;;  %v3590_v3 = vld [vmem:[#allocation7 + $0x28] sm:$0xff]   ;;  %v3593_v16 = vld [vmem:[#allocation7 + $0x20] sm:$0xff]  }
 0x4d3   :  { %3339 = vmatpush3.bf16.msra.mxu1 %v3552_v5  ;;  %v3592_v5 = vld [vmem:[#allocation7 + $0x60] sm:$0xff]  }
 0x4d4   :  { %3340 = vmatprep.subr.bf16.mxu1 %v3747_v1 }
 0x4d7   :  { %3341 = vmatpush3.bf16.msra.mxu1 %v3553_v7  ;;  %v3596_v7 = vld [vmem:[#allocation7 + $0x18] sm:$0xff]  }
 0x4d8   :  { %3342 = vmatprep.subr.bf16.mxu1 %v3747_v1 }
 0x4db   :  { %3343 = vmatpush3.bf16.msra.mxu1 %v3554_v10  ;;  %v3599_v10 = vld [vmem:[#allocation7 + $0x10] sm:$0xff]  }
 0x4dc   :  { %3344 = vmatprep.subr.bf16.mxu1 %v3747_v1 }
 0x4de   :  { %v3966_v8 = vpop.eup %3639 }
 0x4df   :  { %v1511_v9 = vpack.c.bf16 %v3966_v8, %v3966_v8  ;;  %3345 = vmatpush3.bf16.msra.mxu1 %v3555_v12  ;;  %v3601_v12 = vld [vmem:[#allocation7 + $0x48] sm:$0xff]  }
 0x4e0   :  { %3346 = vmatprep.subr.bf16.mxu1 %v3747_v1 }
 0x4e1   :  { %1672 = vmatprep.mubr.bf16.mxu0 %v1511_v9  ;;  %v3598_v9 = vld [vmem:[#allocation7 + $0x50] sm:$0xff]  }
 0x4e2   :  { %1673 = vmatmul.mubr.bf16.vlgmr.msra.gmra.mxu0 %v1510_v61  ;;  %v3585_v61 = vld [vmem:[#allocation9 + $0x38] sm:$0xff]  }
 0x4e3   :  { %3347 = vmatpush3.bf16.msra.mxu1 %v3556_v13  ;;  %3097 = vmatpush3.bf16.msra.mxu0 %v3559_v19  ;;  %v3602_v13 = vld [vmem:[#allocation7 + $0x8] sm:$0xff]  }
 0x4e4   :  { %3348 = vmatprep.subr.bf16.mxu1 %v3747_v1  ;;  %3098 = vmatprep.subr.bf16.mxu0 %v3560_v20 }
 0x4e7   :  { %3349 = vmatpush3.bf16.msra.mxu1 %v3558_v17  ;;  %3099 = vmatpush3.bf16.msra.mxu0 %v3562_v22  ;;  %v3605_v17 = vld [vmem:[#allocation7] sm:$0xff]  }
 0x4e8   :  { %3350 = vmatprep.subr.bf16.mxu1 %v3747_v1  ;;  %3100 = vmatprep.subr.bf16.mxu0 %v3563_v23 }
 0x4eb   :  { %3351 = vmatpush3.bf16.msra.mxu1 %v3561_v21  ;;  %3101 = vmatpush3.bf16.msra.mxu0 %v3564_v24 }
 0x4ec   :  { %3356 = vmatprep.subr.bf16.mxu1 %v3747_v1  ;;  %3102 = vmatprep.subr.bf16.mxu0 %v3565_v25 }
 0x4ef   :  { %3103 = vmatpush3.bf16.msra.mxu0 %v3566_v26  ;;  %v3588_v26 = vld [vmem:[#allocation9 + $0x30] sm:$0xff]  }
 0x4f0   :  { %3104 = vmatprep.subr.bf16.mxu0 %v3567_v27  ;;  %v2534_v27 = vpack.c.bf16 %v3932_v44, %v3913_v62  ;;  %v3600_v62 = vld [vmem:[#allocation9 + $0x10] sm:$0xff]   ;;  %v3603_v44 = vld [vmem:[#allocation9 + $0x8] sm:$0xff]  }
 0x4f3   :  { %3105 = vmatpush3.bf16.msra.mxu0 %v3568_v11  ;;  %v3591_v11 = vld [vmem:[#allocation9 + $0x28] sm:$0xff]  }
 0x4f4   :  { %3106 = vmatprep.subr.bf16.mxu0 %v3569_v29 }
 0x4f7   :  { %3107 = vmatpush3.bf16.msra.mxu0 %v3570_v30  ;;  %v3594_v30 = vld [vmem:[#allocation9 + $0x20] sm:$0xff]  }
 0x4f8   :  { %3108 = vmatprep.subr.bf16.mxu0 %v3571_v31 }
 0x4fb   :  { %3109 = vmatpush3.bf16.msra.mxu0 %v3572_v32 }
 0x4fc   :  { %3110 = vmatprep.subr.bf16.mxu0 %v3573_v33  ;;  %v3597_v33 = vld [vmem:[#allocation9 + $0x18] sm:$0xff]  }
 0x4ff   :  { %3111 = vmatpush3.bf16.msra.mxu0 %v3574_v34 }
 0x500   :  { %3127 = vmatprep.subr.bf16.mxu0 %v3583_v59 }
 0x58e   :  { %v1783_v36 = vpop.f32.mrf.mxu1 }
 0x58f   :  { %v1789_v37 = vadd.f32 %v1783_v36, %v253_v35  ;;  %v3606_v36 = vld [vmem:[#allocation9] sm:$0xff]  }
 0x590   :  { %v3334_v38 = vpop.f32.mrf.mxu1 }
 0x591   :  { %3641 = vtanh.f32 %v1789_v37 }
 0x592   :  { %v1786_v39 = vpop.f32.mrf.mxu1 }
 0x593   :  { %v2535_v39 = vpack.c.bf16 %v3966_v8, %v3950_v28  ;;  %v3615_v28 = vld [vmem:[#allocation7 + $0x58] sm:$0xff]  }
 0x594   :  { %v3335_v40 = vpop.f32.mrf.mxu1  ;;  %v3616_v8 = vld [vmem:[#allocation7 + $0x18] sm:$0xff]  }
 0x59e   :  { %v3642_v41 = vpop.eup %3641 }
 0x59f   :  { %v1791_v43 = vpack.c.bf16 %v3642_v41, %v3642_v41  ;;  %v3607_v41 = vld [vmem:[#allocation7 + $0x78] sm:$0xff]  }
 0x5a1   :  { %3353 = vmatmul.mubr.bf16.vlgmr.msra.gmra.mxu1 %v1791_v43 }
 0x5a2   :  { %v3081_v6 = vpop.f32.mrf.mxu0  ;;  %3357 = vmatpush3.bf16.msra.mxu1 %v3575_v42  ;;  %3372 = vmatprep.mubr.msk.bf16.mxu1 %vm3748_vm0, %v3747_v1  ;;  %v3608_v42 = vld [vmem:[#allocation7 + $0x38] sm:$0xff]  }
 0x5a3   :  { %3358 = vmatprep.subr.bf16.mxu1 %v3747_v1 }
 0x5a4   :  { %v3082_v47 = vpop.f32.mrf.mxu0 }
 0x5a5   :  { %v3083_v4 = vadd.f32 %v3082_v47, %v3081_v6  ;;  %v3610_v6 = vld [vmem:[#allocation7 + $0x30] sm:$0xff]   ;;  %v3612_v47 = vld [vmem:[#allocation7 + $0x28] sm:$0xff]  }
 0x5a6   :  { %v3084_v45 = vpop.f32.mrf.mxu0  ;;  %3359 = vmatpush3.bf16.msra.mxu1 %v3576_v46  ;;  %v3611_v46 = vld [vmem:[#allocation7 + $0x68] sm:$0xff]  }
 0x5a7   :  { %v1675_v49 = vadd.f32 %v3083_v4, %v3910_v50  ;;  %3360 = vmatprep.subr.bf16.mxu1 %v3747_v1  ;;  %v3613_v4 = vld [vmem:[#allocation7 + $0x60] sm:$0xff]  }
 0x5a8   :  { %v3085_v51 = vpop.f32.mrf.mxu0  ;;  %v3614_v45 = vld [vmem:[#allocation7 + $0x20] sm:$0xff]  }
 0x5a9   :  { %3643 = vtanh.f32 %v1675_v49  ;;  %v3618_v49 = vld [vmem:[#allocation7 + $0x10] sm:$0xff]   ;;  %v3619_v51 = vld [vmem:[#allocation7 + $0x48] sm:$0xff]  }
 0x5aa   :  { %3361 = vmatpush3.bf16.msra.mxu1 %v3577_v48  ;;  %v3617_v48 = vld [vmem:[#allocation7 + $0x50] sm:$0xff]  }
 0x5ab   :  { %3362 = vmatprep.subr.bf16.mxu1 %v3747_v1 }
 0x5ae   :  { %3363 = vmatpush3.bf16.msra.mxu1 %v3578_v52  ;;  %v3620_v52 = vld [vmem:[#allocation7 + $0x8] sm:$0xff]  }
 0x5af   :  { %3364 = vmatprep.subr.bf16.mxu1 %v3747_v1 }
 0x5b2   :  { %3365 = vmatpush3.bf16.msra.mxu1 %v3579_v55 }
 0x5b3   :  { %3366 = vmatprep.subr.bf16.mxu1 %v3747_v1 }
 0x5b6   :  { %v3984_v53 = vpop.eup %3643  ;;  %3367 = vmatpush3.bf16.msra.mxu1 %v3580_v56 }
 0x5b7   :  { %v1792_v54 = vpack.c.bf16 %v3984_v53, %v3984_v53  ;;  %3368 = vmatprep.subr.bf16.mxu1 %v3747_v1 }
 0x5b9   :  { %1953 = vmatprep.mubr.bf16.mxu0 %v1792_v54  ;;  %v3622_v54 = vld [vmem:[#allocation7] sm:$0xff]  }
 0x5ba   :  { %1954 = vmatmul.mubr.bf16.vlgmr.msra.gmra.mxu0 %v1791_v43  ;;  %3369 = vmatpush3.bf16.msra.mxu1 %v3581_v57  ;;  %v3609_v43 = vld [vmem:[#allocation7 + $0x70] sm:$0xff]  }
 0x5bb   :  { %3370 = vmatprep.subr.bf16.mxu1 %v3747_v1  ;;  %3128 = vmatpush3.bf16.msra.mxu0 %v3584_v60  ;;  %v3595_v1 = vld [vmem:[#allocation7 + $0x58] sm:$0xff]  }
 0x5bc   :  { %3129 = vmatprep.subr.bf16.mxu0 %v3586_v63 }
 0x5be   :  { %3371 = vmatpush3.bf16.msra.mxu1 %v3582_v58 }
 0x5bf   :  { %3376 = vmatprep.subr.bf16.mxu1 %v3585_v61  ;;  %3130 = vmatpush3.bf16.msra.mxu0 %v3587_v0 }
 0x5c0   :  { %3131 = vmatprep.subr.bf16.mxu0 %v3589_v2 }
 0x5c3   :  { %3132 = vmatpush3.bf16.msra.mxu0 %v3590_v3 }
 0x5c4   :  { %3133 = vmatprep.subr.bf16.mxu0 %v3592_v5 }
 0x5c7   :  { %3134 = vmatpush3.bf16.msra.mxu0 %v3593_v16 }
 0x5c8   :  { %3135 = vmatprep.subr.bf16.mxu0 %v3595_v1 }
 0x5cb   :  { %3136 = vmatpush3.bf16.msra.mxu0 %v3596_v7 }
 0x5cc   :  { %3137 = vmatprep.subr.bf16.mxu0 %v3598_v9 }
 0x5cf   :  { %3138 = vmatpush3.bf16.msra.mxu0 %v3599_v10 }
 0x5d0   :  { %3139 = vmatprep.subr.bf16.mxu0 %v3601_v12 }
 0x5d3   :  { %3140 = vmatpush3.bf16.msra.mxu0 %v3602_v13 }
 0x5d4   :  { %3141 = vmatprep.subr.bf16.mxu0 %v3604_v15 }
 0x5d7   :  { %3142 = vmatpush3.bf16.msra.mxu0 %v3605_v17 }
 0x5d8   :  { %3158 = vmatprep.subr.bf16.mxu0 %v3607_v41 }
 0x661   :  { %v2064_v19 = vpop.f32.mrf.mxu1 }
 0x662   :  { %v2070_v20 = vadd.f32 %v2064_v19, %v3885_v14 }
 0x663   :  { %v3354_v21 = vpop.f32.mrf.mxu1 }
 0x664   :  { %3645 = vtanh.f32 %v2070_v20 }
 0x665   :  { %v2067_v22 = vpop.f32.mrf.mxu1 }
 0x667   :  { %v3355_v23 = vpop.f32.mrf.mxu1 }
 0x671   :  { %v3646_v24 = vpop.eup %3645 }
 0x672   :  { %v2072_v25 = vpack.c.bf16 %v3646_v24, %v3646_v24 }
 0x674   :  { %3373 = vmatmul.mubr.bf16.vlgmr.msra.gmra.mxu1 %v2072_v25 }
 0x675   :  { %3377 = vmatpush3.bf16.msra.mxu1 %v3585_v61  ;;  %3392 = vmatprep.mubr.bf16.mxu1 %v2534_v27 }
 0x676   :  { %3378 = vmatprep.subr.bf16.mxu1 %v3588_v26 }
 0x679   :  { %3379 = vmatpush3.bf16.msra.mxu1 %v3588_v26 }
 0x67a   :  { %v3112_v29 = vpop.f32.mrf.mxu0  ;;  %3380 = vmatprep.subr.bf16.mxu1 %v3591_v11 }
 0x67c   :  { %v3113_v14 = vpop.f32.mrf.mxu0 }
 0x67d   :  { %v3114_v31 = vadd.f32 %v3113_v14, %v3112_v29  ;;  %3381 = vmatpush3.bf16.msra.mxu1 %v3591_v11 }
 0x67e   :  { %v3115_v32 = vpop.f32.mrf.mxu0  ;;  %3382 = vmatprep.subr.bf16.mxu1 %v3594_v30 }
 0x67f   :  { %v1956_v34 = vadd.f32 %v3114_v31, %v3910_v50 }
 0x680   :  { %v3116_v35 = vpop.f32.mrf.mxu0 }
 0x681   :  { %3647 = vtanh.f32 %v1956_v34  ;;  %3383 = vmatpush3.bf16.msra.mxu1 %v3594_v30 }
 0x682   :  { %3384 = vmatprep.subr.bf16.mxu1 %v3597_v33 }
 0x685   :  { %3385 = vmatpush3.bf16.msra.mxu1 %v3597_v33 }
 0x686   :  { %3386 = vmatprep.subr.bf16.mxu1 %v3600_v62 }
 0x689   :  { %3387 = vmatpush3.bf16.msra.mxu1 %v3600_v62 }
 0x68a   :  { %3388 = vmatprep.subr.bf16.mxu1 %v3603_v44 }
 0x68d   :  { %3389 = vmatpush3.bf16.msra.mxu1 %v3603_v44 }
 0x68e   :  { %v3648_v37 = vpop.eup %3647  ;;  %3390 = vmatprep.subr.bf16.mxu1 %v3606_v36 }
 0x68f   :  { %v2073_v38 = vpack.c.bf16 %v3648_v37, %v3648_v37  ;;  %v2536_v40 = vpack.c.bf16 %v3648_v37, %v3984_v53  ;;  %v3621_v53 = vld [vmem:[#allocation7 + $0x40] sm:$0xff]  }
 0x691   :  { %3391 = vmatpush3.bf16.msra.mxu1 %v3606_v36  ;;  %2234 = vmatprep.mubr.bf16.mxu0 %v2073_v38 }
 0x692   :  { %2235 = vmatmul.mubr.bf16.vlgmr.msra.gmra.mxu0 %v2072_v25 }
 0x693   :  { %3159 = vmatpush3.bf16.msra.mxu0 %v3608_v42 }
 0x694   :  { %3393 = vmatmul.mubr.bf16.vlgmr.msra.gmra.mxu1 %v2535_v39  ;;  %3160 = vmatprep.subr.bf16.mxu0 %v3609_v43 }
 0x695   :  { %3396 = vmatprep.mubr.bf16.mxu1 %v2536_v40 }
 0x697   :  { %3161 = vmatpush3.bf16.msra.mxu0 %v3610_v6 }
 0x698   :  { %3162 = vmatprep.subr.bf16.mxu0 %v3611_v46 }
 0x69b   :  { %3163 = vmatpush3.bf16.msra.mxu0 %v3612_v47 }
 0x69c   :  { %3164 = vmatprep.subr.bf16.mxu0 %v3613_v4 }
 0x69f   :  { %3165 = vmatpush3.bf16.msra.mxu0 %v3614_v45 }
 0x6a0   :  { %3166 = vmatprep.subr.bf16.mxu0 %v3615_v28 }
 0x6a3   :  { %3167 = vmatpush3.bf16.msra.mxu0 %v3616_v8 }
 0x6a4   :  { %3168 = vmatprep.subr.bf16.mxu0 %v3617_v48 }
 0x6a7   :  { %3169 = vmatpush3.bf16.msra.mxu0 %v3618_v49 }
 0x6a8   :  { %3170 = vmatprep.subr.bf16.mxu0 %v3619_v51 }
 0x6ab   :  { %3171 = vmatpush3.bf16.msra.mxu0 %v3620_v52 }
 0x6ac   :  { %3172 = vmatprep.subr.bf16.mxu0 %v3621_v53 }
 0x6af   :  { %3173 = vmatpush3.bf16.msra.mxu0 %v3622_v54 }
 0x734   :  { %v2345_v55 = vpop.f32.mrf.mxu1 }
 0x735   :  { %v2351_v60 = vadd.f32 %v2345_v55, %v3891_v18 }
 0x736   :  { %v3374_v56 = vpop.f32.mrf.mxu1 }
 0x737   :  { %3649 = vtanh.f32 %v2351_v60 }
 0x738   :  { %v2348_v57 = vpop.f32.mrf.mxu1 }
 0x73a   :  { %v3375_v58 = vpop.f32.mrf.mxu1 }
 0x744   :  { %v3650_v9 = vpop.eup %3649 }
 0x745   :  { %v2353_v18 = vpack.c.bf16 %v3650_v9, %v3650_v9 }
 0x752   :  { %v3143_v59 = vpop.f32.mrf.mxu0 }
 0x754   :  { %v3394_v61 = vpop.f32.mrf.mxu1  ;;  %v3144_v63 = vpop.f32.mrf.mxu0 }
 0x755   :  { %2669 = vst [vmem:[#allocation10 + $0x10] sm:$0xff] %v3394_v61  ;;  %v3145_v0 = vadd.f32 %v3144_v63, %v3143_v59 }
 0x756   :  { %v2636_v2 = vpop.f32.mrf.mxu1  ;;  %v3146_v3 = vpop.f32.mrf.mxu0 }
 0x757   :  { %v2237_v5 = vadd.f32 %v3145_v0, %v3910_v50  ;;  %2667 = vst [vmem:[#allocation10] sm:$0xff] %v2636_v2 }
 0x758   :  { %v3395_v16 = vpop.f32.mrf.mxu1  ;;  %v3147_v1 = vpop.f32.mrf.mxu0 }
 0x759   :  { %3651 = vtanh.f32 %v2237_v5  ;;  %2670 = vst [vmem:[#allocation10 + $0x18] sm:$0xff] %v3395_v16 }
 0x75a   :  { %v2639_v7 = vpop.f32.mrf.mxu1 }
 0x75b   :  { %2668 = vst [vmem:[#allocation10 + $0x8] sm:$0xff] %v2639_v7 }
 0x766   :  { %v3652_v10 = vpop.eup %3651 }
 0x767   :  { %v2354_v12 = vpack.c.bf16 %v3652_v10, %v3652_v10 }
 0x769   :  { %2515 = vmatprep.mubr.bf16.mxu0 %v2354_v12 }
 0x76a   :  { %2516 = vmatmul.mubr.bf16.vlgmr.msra.gmra.mxu0 %v2353_v18 }
 0x82a   :  { %v3174_v13 = vpop.f32.mrf.mxu0 }
 0x82c   :  { %v3175_v15 = vpop.f32.mrf.mxu0 }
 0x82d   :  { %v3176_v17 = vadd.f32 %v3175_v15, %v3174_v13 }
 0x82e   :  { %v3177_v19 = vpop.f32.mrf.mxu0 }
 0x82f   :  { %v2518_v20 = vadd.f32 %v3176_v17, %v3910_v50 }
 0x830   :  { %v3178_v21 = vpop.f32.mrf.mxu0 }
 0x831   :  { %3653 = vtanh.f32 %v2518_v20 }
 0x83e   :  { %v3654_v22 = vpop.eup %3653 }
 0x83f   :  { %v2537_v23 = vpack.c.bf16 %v3654_v22, %v3652_v10 }
 0x841   :  { %3397 = vmatmul.mubr.bf16.gmra.mxu1 %v2537_v23 }
 0x901   :  { %v3398_v24 = vpop.f32.mrf.mxu1 }
 0x902   :  { %2673 = vst [vmem:[#allocation10 + $0x30] sm:$0xff] %v3398_v24 }
 0x903   :  { %v2652_v25 = vpop.f32.mrf.mxu1 }
 0x904   :  { %2671 = vst [vmem:[#allocation10 + $0x20] sm:$0xff] %v2652_v25 }
 0x905   :  { %v3399_v26 = vpop.f32.mrf.mxu1 }
 0x906   :  { %2674 = vst [vmem:[#allocation10 + $0x38] sm:$0xff] %v3399_v26 }
 0x907   :  { %v2655_v27 = vpop.f32.mrf.mxu1 }
 0x908   :  { %2672 = vst [vmem:[#allocation10 + $0x28] sm:$0xff] %v2655_v27 }
 0x909   :  { %3726 = shalt.err (!%p3723_p5)
}
 0x90a   :  { %s3752_s20 = smov 128   ;;  %s3753_s21 = smov 8  }
 0x90b   :  { %2686 = dma.vmem_to_hbm [thread:$0]  %s2681_s18, 1024, %s4010_s6, [#allocation6], %s3752_s20, %s3752_s20, %s3753_s21  }
 0x90c   :  { %3739 = dma.done.wait [#allocation6], 1024  }
 0x90d   :  { %3740 = vsyncadd [#allocation6], 4294966272 }
 0x90e   :  { %2690 = vsyncpa [#allocation5], 1 }
 0x90f   :  { %2691 = vsyncpa [#allocation8], 1 }
 0x910   :  { %2692 = vsyncpa [#allocation6], 1 }

</bundles_post_ra>
